<compile_context>
chip_gen: v7x
topology: tpu7x:2x2x1
jax: 0.10.0
libtpu: 0.0.40
codegen_flags: <defaults>
</compile_context>

<pallas_src>
import jax
import jax.numpy as jnp
from jax.experimental import pallas as pl
from jax.experimental.pallas import tpu as pltpu

LANE = 128  # TPU lane width (last-dim alignment)


def _round_up(n, m):
    return ((n + m - 1) // m) * m


def _cdiv(a, b):
    return (a + b - 1) // b


def _pick_tile_b(batch):
    """Batch rows per grid step.

    <=128 rows: one 128-row tile. Larger: grow the tile (cap 512) to amortize
    per-step pipeline overhead, but keep >=2 grid steps so megacore sharding
    (v7x, 2 TCs) engages via dimension_semantics=("parallel",).
    """
    if batch <= 128:
        return 128
    half = _round_up(_cdiv(batch, 2), 128)
    return min(512, half)


def qnetwork_kernel(x_ref, w1_ref, b1_ref, w2_ref, b2_ref,
                    w3_ref, b3_ref, w4_ref, b4_ref, out_ref):
    """Fused MLP forward for one batch tile.

    bf16 matmuls on the MXU with f32 accumulation; bias-add/ReLU in f32;
    downcast to bf16 only at the next dot's input. Garbage rows of a partial
    final block never mix across rows and are discarded by the caller.
    """
    x = x_ref[...].astype(jnp.bfloat16)  # f32 [TILE_B, state_size] -> bf16

    h = jnp.dot(x, w1_ref[...], preferred_element_type=jnp.float32) + b1_ref[...]
    h = jnp.maximum(h, 0.0)
    # dropout(p=0.2) -> identity in eval mode

    h = jnp.dot(h.astype(jnp.bfloat16), w2_ref[...],
                preferred_element_type=jnp.float32) + b2_ref[...]
    h = jnp.maximum(h, 0.0)

    h = jnp.dot(h.astype(jnp.bfloat16), w3_ref[...],
                preferred_element_type=jnp.float32) + b3_ref[...]
    h = jnp.maximum(h, 0.0)

    h = jnp.dot(h.astype(jnp.bfloat16), w4_ref[...],
                preferred_element_type=jnp.float32) + b4_ref[...]
    out_ref[...] = h.astype(out_ref.dtype)  # lane-dense (TILE_B, 128) store


def prepare_params(params):
    """One-time prep: pad w4/b4 cols to the lane width, cast weights to bf16."""
    w1, b1 = params["w1"], params["b1"]
    w2, b2 = params["w2"], params["b2"]
    w3, b3 = params["w3"], params["b3"]
    w4, b4 = params["w4"], params["b4"]

    state_size = w1.shape[0]
    action_size = w4.shape[1]
    n_pad = _round_up(action_size, LANE)

    w4p = jnp.zeros((w4.shape[0], n_pad), jnp.float32).at[:, :action_size].set(w4)
    b4p = jnp.zeros((1, n_pad), jnp.float32).at[:, :action_size].set(b4)

    return {
        "w1": w1.astype(jnp.bfloat16), "b1": b1.astype(jnp.float32),
        "w2": w2.astype(jnp.bfloat16), "b2": b2.astype(jnp.float32),
        "w3": w3.astype(jnp.bfloat16), "b3": b3.astype(jnp.float32),
        "w4": w4p.astype(jnp.bfloat16), "b4": b4p.astype(jnp.float32),
        "state_size": state_size, "action_size": action_size,
    }


def qnetwork_forward(x, prepared, out_dtype=jnp.bfloat16):
    """x: [B, state_size] float32 (unpadded). prepared: output of prepare_params."""
    w1, b1 = prepared["w1"], prepared["b1"]
    w2, b2 = prepared["w2"], prepared["b2"]
    w3, b3 = prepared["w3"], prepared["b3"]
    w4, b4 = prepared["w4"], prepared["b4"]
    state_size = prepared["state_size"]
    action_size = prepared["action_size"]

    B = x.shape[0]
    n_pad = w4.shape[1]
    tile_b = _pick_tile_b(B)
    grid = (_cdiv(B, tile_b),)

    def fixed(a):
        # Weights/biases: same full block every grid step (stay VMEM-resident).
        # (Considered pipeline_mode=pl.Buffered(1) to drop the redundant second
        # buffer for these constant blocks; kept default for robustness.)
        return pl.BlockSpec(a.shape, lambda i: (0,) * a.ndim)

    f1, f2, f3 = w1.shape[1], w2.shape[1], w3.shape[1]
    flops = 2 * B * (state_size * f1 + f1 * f2 + f2 * f3 + f3 * n_pad)
    bytes_accessed = (
        int(x.size) * x.dtype.itemsize
        + sum(int(p.size) * p.dtype.itemsize
              for p in (w1, b1, w2, b2, w3, b3, w4, b4))
        + B * n_pad * jnp.dtype(out_dtype).itemsize)

    out = pl.pallas_call(
        qnetwork_kernel,
        out_shape=jax.ShapeDtypeStruct((B, n_pad), out_dtype),
        grid=grid,
        in_specs=[pl.BlockSpec((tile_b, state_size), lambda i: (i, 0)),
                  fixed(w1), fixed(b1), fixed(w2), fixed(b2),
                  fixed(w3), fixed(b3), fixed(w4), fixed(b4)],
        out_specs=pl.BlockSpec((tile_b, n_pad), lambda i: (i, 0)),
        compiler_params=pltpu.CompilerParams(
            dimension_semantics=("parallel",)),
        cost_estimate=pl.CostEstimate(
            flops=flops, transcendentals=0, bytes_accessed=bytes_accessed),
    )(x, w1, b1, w2, b2, w3, b3, w4, b4)

    # Slice off padded action lanes; return f32 Q-values.
    return out[:, :action_size].astype(jnp.float32)


def init_params(key, state_size, action_size,
                fc1_units=256, fc2_units=256, fc3_units=128):
    """Deterministic init mimicking PyTorch Linear default (uniform +-1/sqrt(fan_in))."""
    def linear(key, fan_in, fan_out):
        kw, kb = jax.random.split(key)
        bound = 1.0 / jnp.sqrt(fan_in)
        w = jax.random.uniform(kw, (fan_in, fan_out), jnp.float32, -bound, bound)
        b = jax.random.uniform(kb, (1, fan_out), jnp.float32, -bound, bound)
        return w, b

    k1, k2, k3, k4 = jax.random.split(key, 4)
    w1, b1 = linear(k1, state_size, fc1_units)
    w2, b2 = linear(k2, fc1_units, fc2_units)
    w3, b3 = linear(k3, fc2_units, fc3_units)
    w4, b4 = linear(k4, fc3_units, action_size)
    return {"w1": w1, "b1": b1, "w2": w2, "b2": b2,
            "w3": w3, "b3": b3, "w4": w4, "b4": b4}


def reference_forward_f32(x, p):
    h = jnp.maximum(x @ p["w1"] + p["b1"], 0.0)
    h = jnp.maximum(h @ p["w2"] + p["b2"], 0.0)
    h = jnp.maximum(h @ p["w3"] + p["b3"], 0.0)
    return h @ p["w4"] + p["b4"]


def reference_forward_bf16(x, p):
    """Same bf16-matmul / f32-accumulate path as the kernel (tight tolerance check)."""
    def mm(a, w):
        return jnp.dot(a.astype(jnp.bfloat16), w.astype(jnp.bfloat16),
                       preferred_element_type=jnp.float32)
    h = jnp.maximum(mm(x, p["w1"]) + p["b1"], 0.0)
    h = jnp.maximum(mm(h, p["w2"]) + p["b2"], 0.0)
    h = jnp.maximum(mm(h, p["w3"]) + p["b3"], 0.0)
    return mm(h, p["w4"]) + p["b4"]


if __name__ == "__main__":
    state_size = 8
    action_size = 4
    batch = 2

    key = jax.random.PRNGKey(0)
    kx, kp = jax.random.split(key)
    x = jax.random.normal(kx, (batch, state_size), jnp.float32)
    params = init_params(kp, state_size, action_size)
    prepared = prepare_params(params)

    out = qnetwork_forward(x, prepared)
    out = jax.block_until_ready(out)

    ref_bf16 = reference_forward_bf16(x, params)
    ref_f32 = reference_forward_f32(x, params)

    assert out.shape == (batch, action_size)
    assert jnp.allclose(out, ref_bf16, atol=1e-2, rtol=1e-2), \
        "mismatch vs bf16-path JAX reference"
    assert jnp.allclose(out, ref_f32, atol=1e-1, rtol=1e-1), \
        "Q-values drifted too far from f32 reference"

    print("KERNEL_OK")
</pallas_src>

<mosaic_0001>
module attributes {stable_mosaic.version = 11 : i64} {
  func.func @qnetwork_kernel(%arg0: i32, %arg1: memref<128x8xf32, #tpu.memory_space<vmem>>, %arg2: memref<8x256xbf16, #tpu.memory_space<vmem>>, %arg3: memref<1x256xf32, #tpu.memory_space<vmem>>, %arg4: memref<256x256xbf16, #tpu.memory_space<vmem>>, %arg5: memref<1x256xf32, #tpu.memory_space<vmem>>, %arg6: memref<256x128xbf16, #tpu.memory_space<vmem>>, %arg7: memref<1x128xf32, #tpu.memory_space<vmem>>, %arg8: memref<128x128xbf16, #tpu.memory_space<vmem>>, %arg9: memref<1x128xf32, #tpu.memory_space<vmem>>, %arg10: memref<128x128xbf16, #tpu.memory_space<vmem>>) attributes {dimension_semantics = [#tpu.dimension_semantics<parallel>], iteration_bounds = array<i64: 1>, scalar_prefetch = 0 : i64, scratch_operands = 0 : i64, tpu.core_type = #tpu.core_type<tc>, window_params = [{transform_indices = @transform_0, window_bounds = array<i64: 128, 8>}, {pipeline_mode = #tpu.pipeline_mode<synchronous>, transform_indices = @transform_1, window_bounds = array<i64: 8, 256>}, {pipeline_mode = #tpu.pipeline_mode<synchronous>, transform_indices = @transform_2, window_bounds = array<i64: 1, 256>}, {pipeline_mode = #tpu.pipeline_mode<synchronous>, transform_indices = @transform_3, window_bounds = array<i64: 256, 256>}, {pipeline_mode = #tpu.pipeline_mode<synchronous>, transform_indices = @transform_4, window_bounds = array<i64: 1, 256>}, {pipeline_mode = #tpu.pipeline_mode<synchronous>, transform_indices = @transform_5, window_bounds = array<i64: 256, 128>}, {pipeline_mode = #tpu.pipeline_mode<synchronous>, transform_indices = @transform_6, window_bounds = array<i64: 1, 128>}, {pipeline_mode = #tpu.pipeline_mode<synchronous>, transform_indices = @transform_7, window_bounds = array<i64: 128, 128>}, {pipeline_mode = #tpu.pipeline_mode<synchronous>, transform_indices = @transform_8, window_bounds = array<i64: 1, 128>}, {transform_indices = @transform_9, window_bounds = array<i64: 128, 128>}]} {
    %c0 = arith.constant 0 : index
    %c0_0 = arith.constant 0 : index
    %0 = vector.load %arg1[%c0, %c0_0] : memref<128x8xf32, #tpu.memory_space<vmem>>, vector<128x8xf32>
    %1 = arith.truncf %0 : vector<128x8xf32> to vector<128x8xbf16>
    %c0_1 = arith.constant 0 : index
    %c0_2 = arith.constant 0 : index
    %2 = vector.load %arg2[%c0_1, %c0_2] : memref<8x256xbf16, #tpu.memory_space<vmem>>, vector<8x256xbf16>
    %cst = arith.constant dense<0.000000e+00> : vector<128x256xf32>
    %3 = tpu.matmul %1, %2, %cst {dimension_numbers = #tpu.dot_dimension_numbers<[1], [0], [0], [1], [0, 0, 1, 1], [], []>} : vector<128x8xbf16>, vector<8x256xbf16>, vector<128x256xf32> -> vector<128x256xf32>
    %c0_3 = arith.constant 0 : index
    %c0_4 = arith.constant 0 : index
    %4 = vector.load %arg3[%c0_3, %c0_4] : memref<1x256xf32, #tpu.memory_space<vmem>>, vector<1x256xf32>
    %5 = vector.broadcast %4 : vector<1x256xf32> to vector<128x256xf32>
    %6 = arith.addf %3, %5 : vector<128x256xf32>
    %cst_5 = arith.constant 0.000000e+00 : f32
    %7 = vector.broadcast %cst_5 : f32 to vector<128x256xf32>
    %8 = arith.maximumf %6, %7 : vector<128x256xf32>
    %9 = arith.truncf %8 : vector<128x256xf32> to vector<128x256xbf16>
    %c0_6 = arith.constant 0 : index
    %c0_7 = arith.constant 0 : index
    %10 = vector.load %arg4[%c0_6, %c0_7] : memref<256x256xbf16, #tpu.memory_space<vmem>>, vector<256x256xbf16>
    %cst_8 = arith.constant dense<0.000000e+00> : vector<128x256xf32>
    %11 = tpu.matmul %9, %10, %cst_8 {dimension_numbers = #tpu.dot_dimension_numbers<[1], [0], [0], [1], [0, 0, 1, 1], [], []>} : vector<128x256xbf16>, vector<256x256xbf16>, vector<128x256xf32> -> vector<128x256xf32>
    %c0_9 = arith.constant 0 : index
    %c0_10 = arith.constant 0 : index
    %12 = vector.load %arg5[%c0_9, %c0_10] : memref<1x256xf32, #tpu.memory_space<vmem>>, vector<1x256xf32>
    %13 = vector.broadcast %12 : vector<1x256xf32> to vector<128x256xf32>
    %14 = arith.addf %11, %13 : vector<128x256xf32>
    %cst_11 = arith.constant 0.000000e+00 : f32
    %15 = vector.broadcast %cst_11 : f32 to vector<128x256xf32>
    %16 = arith.maximumf %14, %15 : vector<128x256xf32>
    %17 = arith.truncf %16 : vector<128x256xf32> to vector<128x256xbf16>
    %c0_12 = arith.constant 0 : index
    %c0_13 = arith.constant 0 : index
    %18 = vector.load %arg6[%c0_12, %c0_13] : memref<256x128xbf16, #tpu.memory_space<vmem>>, vector<256x128xbf16>
    %cst_14 = arith.constant dense<0.000000e+00> : vector<128x128xf32>
    %19 = tpu.matmul %17, %18, %cst_14 {dimension_numbers = #tpu.dot_dimension_numbers<[1], [0], [0], [1], [0, 0, 1, 1], [], []>} : vector<128x256xbf16>, vector<256x128xbf16>, vector<128x128xf32> -> vector<128x128xf32>
    %c0_15 = arith.constant 0 : index
    %c0_16 = arith.constant 0 : index
    %20 = vector.load %arg7[%c0_15, %c0_16] : memref<1x128xf32, #tpu.memory_space<vmem>>, vector<1x128xf32>
    %21 = vector.broadcast %20 : vector<1x128xf32> to vector<128x128xf32>
    %22 = arith.addf %19, %21 : vector<128x128xf32>
    %cst_17 = arith.constant 0.000000e+00 : f32
    %23 = vector.broadcast %cst_17 : f32 to vector<128x128xf32>
    %24 = arith.maximumf %22, %23 : vector<128x128xf32>
    %25 = arith.truncf %24 : vector<128x128xf32> to vector<128x128xbf16>
    %c0_18 = arith.constant 0 : index
    %c0_19 = arith.constant 0 : index
    %26 = vector.load %arg8[%c0_18, %c0_19] : memref<128x128xbf16, #tpu.memory_space<vmem>>, vector<128x128xbf16>
    %cst_20 = arith.constant dense<0.000000e+00> : vector<128x128xf32>
    %27 = tpu.matmul %25, %26, %cst_20 {dimension_numbers = #tpu.dot_dimension_numbers<[1], [0], [0], [1], [0, 0, 1, 1], [], []>} : vector<128x128xbf16>, vector<128x128xbf16>, vector<128x128xf32> -> vector<128x128xf32>
    %c0_21 = arith.constant 0 : index
    %c0_22 = arith.constant 0 : index
    %28 = vector.load %arg9[%c0_21, %c0_22] : memref<1x128xf32, #tpu.memory_space<vmem>>, vector<1x128xf32>
    %29 = vector.broadcast %28 : vector<1x128xf32> to vector<128x128xf32>
    %30 = arith.addf %27, %29 : vector<128x128xf32>
    %31 = arith.truncf %30 : vector<128x128xf32> to vector<128x128xbf16>
    %c0_23 = arith.constant 0 : index
    %c0_24 = arith.constant 0 : index
    %32 = vector.load %arg10[%c0_23, %c0_24] : memref<128x128xbf16, #tpu.memory_space<vmem>>, vector<128x128xbf16>
    tpu.vector_store %arg10[%c0_23, %c0_24], %31 {strides = array<i32>} : memref<128x128xbf16, #tpu.memory_space<vmem>>, vector<128x128xbf16>,
    return
  }
  func.func @transform_0(%arg0: i32) -> (i32, i32) {
    %c0_i32 = arith.constant 0 : i32
    %c0_i32_0 = arith.constant 0 : i32
    return %arg0, %c0_i32 : i32, i32
  }
  func.func @transform_1(%arg0: i32) -> (i32, i32) {
    %c0_i32 = arith.constant 0 : i32
    %c0_i32_0 = arith.constant 0 : i32
    %c0_i32_1 = arith.constant 0 : i32
    return %c0_i32, %c0_i32_0 : i32, i32
  }
  func.func @transform_2(%arg0: i32) -> (i32, i32) {
    %c0_i32 = arith.constant 0 : i32
    %c0_i32_0 = arith.constant 0 : i32
    %c0_i32_1 = arith.constant 0 : i32
    return %c0_i32, %c0_i32_0 : i32, i32
  }
  func.func @transform_3(%arg0: i32) -> (i32, i32) {
    %c0_i32 = arith.constant 0 : i32
    %c0_i32_0 = arith.constant 0 : i32
    %c0_i32_1 = arith.constant 0 : i32
    return %c0_i32, %c0_i32_0 : i32, i32
  }
  func.func @transform_4(%arg0: i32) -> (i32, i32) {
    %c0_i32 = arith.constant 0 : i32
    %c0_i32_0 = arith.constant 0 : i32
    %c0_i32_1 = arith.constant 0 : i32
    return %c0_i32, %c0_i32_0 : i32, i32
  }
  func.func @transform_5(%arg0: i32) -> (i32, i32) {
    %c0_i32 = arith.constant 0 : i32
    %c0_i32_0 = arith.constant 0 : i32
    %c0_i32_1 = arith.constant 0 : i32
    return %c0_i32, %c0_i32_0 : i32, i32
  }
  func.func @transform_6(%arg0: i32) -> (i32, i32) {
    %c0_i32 = arith.constant 0 : i32
    %c0_i32_0 = arith.constant 0 : i32
    %c0_i32_1 = arith.constant 0 : i32
    return %c0_i32, %c0_i32_0 : i32, i32
  }
  func.func @transform_7(%arg0: i32) -> (i32, i32) {
    %c0_i32 = arith.constant 0 : i32
    %c0_i32_0 = arith.constant 0 : i32
    %c0_i32_1 = arith.constant 0 : i32
    return %c0_i32, %c0_i32_0 : i32, i32
  }
  func.func @transform_8(%arg0: i32) -> (i32, i32) {
    %c0_i32 = arith.constant 0 : i32
    %c0_i32_0 = arith.constant 0 : i32
    %c0_i32_1 = arith.constant 0 : i32
    return %c0_i32, %c0_i32_0 : i32, i32
  }
  func.func @transform_9(%arg0: i32) -> (i32, i32) {
    %c0_i32 = arith.constant 0 : i32
    %c0_i32_0 = arith.constant 0 : i32
    return %arg0, %c0_i32 : i32, i32
  }
}

</mosaic_0001>

<bundles_post_ra>
// kernel: tpu_custom_call.1
= control target key start
LH: loop header
LB: loop body
LE: loop exit
PB: predicated region body
PF: predicated region fallthrough
CT: control target
= control target key end

     0   :  { %14 = vsyncpa [#allocation3], 0  ;;  %s2496_s0 = inlined_call_operand.hbm [shape: f32[2,8], index: 0, kind: input, shape index: {}]   ;;  %s2497_s1 = inlined_call_operand.hbm [shape: bf16[8,256], index: 1, kind: input, shape index: {}]   ;;  %s2498_s2 = inlined_call_operand.vmem [shape: f32[1,256], index: 2, kind: input, shape index: {}]   ;;  %s2499_s3 = inlined_call_operand.hbm [shape: bf16[256,256], index: 3, kind: input, shape index: {}]   ;;  %s2500_s4 = inlined_call_operand.vmem [shape: f32[1,256], index: 4, kind: input, shape index: {}]   ;;  %s2501_s5 = inlined_call_operand.hbm [shape: bf16[256,128], index: 5, kind: input, shape index: {}]   ;;  %s2502_s6 = inlined_call_operand.vmem [shape: f32[1,128], index: 6, kind: input, shape index: {}]   ;;  %s2503_s7 = inlined_call_operand.hbm [shape: bf16[128,128], index: 7, kind: input, shape index: {}]   ;;  %s2504_s8 = inlined_call_operand.vmem [shape: f32[1,128], index: 8, kind: input, shape index: {}]   ;;  %s2505_s9 = inlined_call_operand.hbm [shape: bf16[2,128], index: 9, kind: output, shape index: {}]  }
   0x1   :  { %15 = vsyncpa [#allocation6], 0 }
   0x2   :  { %16 = vsyncpa [#allocation9], 0 }
   0x3   :  { %17 = vsyncpa [#allocation4], 0 }
   0x4   :  { %22 = vsyncadd [#allocation3], 2016  ;;  %s2146_s30 = smov [#allocation5]   ;;  %s2147_s11 = smov [#allocation8]  }
   0x5   :  { %s36_s10 = sshll.u32 %s2146_s30, 4  ;;  %s61_s12 = sshll.u32 %s2147_s11, 4  ;;  %s37_s10 = int_to_ptr.vmem [resolvable:$true] %s36_s10  ;;  %s2212_s12 = int_to_ptr.vmem [resolvable:$true] %s61_s12 }
   0x6   :  { %s2006_s15 = scalar_lea.hbm %s2497_s1, 128 }
   0x7   :  { %p2007_p0 = scmp.ne.s32.totalorder %s2497_s1, %s2006_s15  ;;  %p2010_p1 = scmp.lt.u32.totalorder %s2006_s15, %s2497_s1 }
   0x9   :  { %p2012_p2 = pnand %p2010_p1, %p2007_p0 }
   0xb   :  { %2015 = shalt.err (!%p2012_p2)
}
   0xc   :  { %s2016_s20 = scalar_lea.vmem %s37_s10, 128  ;;  %p2021_p4 = scmp.lt.s32.totalorder %s37_s10, %s37_s10 }
   0xd   :  { %p2017_p3 = scmp.ne.s32.totalorder %s37_s10, %s2016_s20  ;;  %p2022_p5 = scmp.lt.s32.totalorder %s2016_s20, %s2016_s20 }
   0xf   :  { %p2023_p6 = por %p2022_p5, %p2021_p4 }
  0x11   :  { %p2024_p7 = pnand %p2023_p6, %p2017_p3 }
  0x13   :  { %2027 = shalt.err (!%p2024_p7)
}
  0x14   :  { %39 = dma.hbm_to_vmem [thread:$0]  %s2497_s1, 128, %s37_s10, [#allocation6]  }
  0x15   :  { %s2028_s25 = scalar_lea.hbm %s2501_s5, 2048 }
  0x16   :  { %p2029_p8 = scmp.ne.s32.totalorder %s2501_s5, %s2028_s25  ;;  %p2032_p9 = scmp.lt.u32.totalorder %s2028_s25, %s2501_s5 }
  0x18   :  { %p2034_p10 = pnand %p2032_p9, %p2029_p8 }
  0x1a   :  { %2037 = shalt.err (!%p2034_p10)
}
  0x1b   :  { %s2038_s30 = scalar_lea.vmem %s2212_s12, 2048  ;;  %p2043_p12 = scmp.lt.s32.totalorder %s2212_s12, %s2212_s12 }
  0x1c   :  { %p2039_p11 = scmp.ne.s32.totalorder %s2212_s12, %s2038_s30  ;;  %p2044_p13 = scmp.lt.s32.totalorder %s2038_s30, %s2038_s30 }
  0x1e   :  { %p2045_p0 = por %p2044_p13, %p2043_p12 }
  0x20   :  { %p2046_p1 = pnand %p2045_p0, %p2039_p11 }
  0x22   :  { %2049 = shalt.err (!%p2046_p1)
}
  0x23   :  { %s2148_s1 = smov 64   ;;  %s2149_s10 = smov 4  }
  0x24   :  { %67 = dma.hbm_to_vmem [thread:$0]  %s2501_s5, 2048, %s2212_s12, [#allocation9], %s2148_s1, %s2148_s1, %s2149_s10  }
  0x25   :  { %s2150_s14 = smov [#allocation2]   ;;  %s2050_s18 = scalar_lea.hbm %s2496_s0, 32 }
  0x26   :  { %s23_s15 = sshll.u32 %s2150_s14, 4  ;;  %p2051_p2 = scmp.ne.s32.totalorder %s2496_s0, %s2050_s18  ;;  %s24_s15 = int_to_ptr.vmem [resolvable:$true] %s23_s15 }
  0x27   :  { %p2054_p3 = scmp.lt.u32.totalorder %s2050_s18, %s2496_s0 }
  0x29   :  { %p2056_p4 = pnand %p2054_p3, %p2051_p2 }
  0x2b   :  { %2059 = shalt.err (!%p2056_p4)
}
  0x2c   :  { %s2060_s23 = scalar_lea.vmem %s24_s15, 32  ;;  %s2064_s5 = scalar_lea.vmem %s24_s15, 2048 }
  0x2d   :  { %p2061_p5 = scmp.ne.s32.totalorder %s24_s15, %s2060_s23  ;;  %p2065_p6 = scmp.lt.s32.totalorder %s24_s15, %s24_s15 }
  0x2e   :  { %p2066_p7 = scmp.lt.s32.totalorder %s2064_s5, %s2060_s23 }
  0x30   :  { %p2067_p8 = por %p2066_p7, %p2065_p6 }
  0x32   :  { %p2068_p9 = pnand %p2067_p8, %p2061_p5 }
  0x34   :  { %2071 = shalt.err (!%p2068_p9)
}
  0x35   :  { %s2151_s12 = smov 32   ;;  %s2152_s24 = smov 2  }
  0x36   :  { %29 = dma.hbm_to_vmem [thread:$0]  %s2496_s0, 32, %s24_s15, [#allocation3], %s2151_s12, %s2151_s12, %s2152_s24  }
  0x37   :  { %s2153_s27 = smov [#allocation7]   ;;  %s2072_s11 = scalar_lea.hbm %s2499_s3, 4096 }
  0x38   :  { %s47_s28 = sshll.u32 %s2153_s27, 4  ;;  %p2073_p10 = scmp.ne.s32.totalorder %s2499_s3, %s2072_s11  ;;  %s48_s28 = int_to_ptr.vmem [resolvable:$true] %s47_s28 }
  0x39   :  { %p2076_p11 = scmp.lt.u32.totalorder %s2072_s11, %s2499_s3 }
  0x3b   :  { %p2078_p12 = pnand %p2076_p11, %p2073_p10 }
  0x3d   :  { %2081 = shalt.err (!%p2078_p12)
}
  0x3e   :  { %s2082_s18 = scalar_lea.vmem %s48_s28, 4096  ;;  %p2087_p0 = scmp.lt.s32.totalorder %s48_s28, %s48_s28 }
  0x3f   :  { %p2083_p13 = scmp.ne.s32.totalorder %s48_s28, %s2082_s18  ;;  %p2088_p1 = scmp.lt.s32.totalorder %s2082_s18, %s2082_s18 }
  0x41   :  { %p2089_p2 = por %p2088_p1, %p2087_p0 }
  0x43   :  { %p2090_p3 = pnand %p2089_p2, %p2083_p13 }
  0x45   :  { %2093 = shalt.err (!%p2090_p3)
}
  0x46   :  { %s2154_s0 = smov 128   ;;  %s2155_s15 = smov 8  }
  0x47   :  { %53 = dma.hbm_to_vmem [thread:$0]  %s2499_s3, 4096, %s48_s28, [#allocation6], %s2154_s0, %s2154_s0, %s2155_s15  }
  0x48   :  { %s2156_s21 = smov [#allocation10]   ;;  %s2094_s12 = scalar_lea.hbm %s2503_s7, 1024 }
  0x49   :  { %s75_s22 = sshll.u32 %s2156_s21, 4  ;;  %p2095_p4 = scmp.ne.s32.totalorder %s2503_s7, %s2094_s12  ;;  %s76_s22 = int_to_ptr.vmem [resolvable:$true] %s75_s22 }
  0x4a   :  { %p2098_p5 = scmp.lt.u32.totalorder %s2094_s12, %s2503_s7 }
  0x4c   :  { %p2100_p6 = pnand %p2098_p5, %p2095_p4 }
  0x4e   :  { %2103 = shalt.err (!%p2100_p6)
}
  0x4f   :  { %s2104_s29 = scalar_lea.vmem %s76_s22, 1024  ;;  %p2109_p8 = scmp.lt.s32.totalorder %s76_s22, %s76_s22 }
  0x50   :  { %p2105_p7 = scmp.ne.s32.totalorder %s76_s22, %s2104_s29  ;;  %p2110_p9 = scmp.lt.s32.totalorder %s2104_s29, %s2104_s29 }
  0x52   :  { %p2111_p10 = por %p2110_p9, %p2109_p8 }
  0x54   :  { %p2112_p11 = pnand %p2111_p10, %p2105_p7 }
  0x56   :  { %2115 = shalt.err (!%p2112_p11)
}
  0x57   :  { %81 = dma.hbm_to_vmem [thread:$0]  %s2503_s7, 1024, %s76_s22, [#allocation9], %s2148_s1, %s2148_s1, %s2149_s10  }
  0x58   :  { %2138 = dma.done.wait [#allocation3], 2048  }
  0x59   :  { %2139 = vsyncadd [#allocation3], 4294965248 }
  0x5a   :  { %2140 = dma.done.wait [#allocation6], 4224  }
  0x5b   :  { %2141 = vsyncadd [#allocation6], 4294963072 }
  0x5c   :  { %2142 = dma.done.wait [#allocation9], 3072  }
  0x5d   :  { %2143 = vsyncadd [#allocation9], 4294964224  ;;  %v2157_v0 = vmov 0   ;;  %v124_v1 = vld [vmem:[#allocation5] sm:$0xff]  ;;  %vm167_vm0 = vcmask 1043456   ;;  %v101_v3 = vld [vmem:[#allocation2 + $0x8] sm:$0xff] }
  0x5e   :  { %206 = vmatprep.mubr.bf16.mxu0 %v2157_v0  ;;  %v100_v2 = vld [vmem:[#allocation2] sm:$0xff]  ;;  %v1680_v4 = vcombine.high %v124_v1, %v124_v1  ;;  %v1679_v5 = vcombine.low %v124_v1, %v124_v1  ;;  %vm142_vm1 = vcmask 64512   ;;  %v102_v8 = vld [vmem:[#allocation2 + $0x10] sm:$0xff]  ;;  %v103_v12 = vld [vmem:[#allocation2 + $0x18] sm:$0xff] }
  0x5f   :  { %v116_v7 = vpack.c.bf16 %v101_v3, %v100_v2  ;;  %v1934_v9 = vld [vmem:[#allocation7 + $0x4] ss:$8 sps:$4 sm:$0xff]   ;;  %v1936_v10 = vld [vmem:[#allocation7] ss:$8 sps:$4 sm:$0xff]   ;;  %v1937_v11 = vld [vmem:[#allocation7 + $0x14] ss:$8 sps:$4 sm:$0xff]   ;;  %v117_v15 = vpack.c.bf16 %v103_v12, %v102_v8 }
  0x60   :  { %1681 = vmatprep.subr.msk.bf16.mxu0 %vm167_vm0, %v1680_v4  ;;  %v169_v6 = vsel %vm167_vm0, %v1679_v5, 0  ;;  %539 = vmatprep.subr.bf16.mxu1 %v1934_v9  ;;  %v1939_v13 = vld [vmem:[#allocation7 + $0x10] ss:$8 sps:$4 sm:$0xff]   ;;  %v1940_v14 = vld [vmem:[#allocation7 + $0x24] ss:$8 sps:$4 sm:$0xff]  }
  0x61   :  { %175 = vmatpush1.bf16.msra.mxu0 %v169_v6  ;;  %540 = vmatpush1.bf16.msra.mxu1 %v1936_v10  ;;  %v1942_v16 = vld [vmem:[#allocation7 + $0x20] ss:$8 sps:$4 sm:$0xff]   ;;  %v1943_v17 = vld [vmem:[#allocation7 + $0x34] ss:$8 sps:$4 sm:$0xff]   ;;  %v1945_v20 = vld [vmem:[#allocation7 + $0x30] ss:$8 sps:$4 sm:$0xff]  }
  0x62   :  { %541 = vmatprep.subr.bf16.mxu1 %v1937_v11  ;;  %v104_v18 = vld [vmem:[#allocation2 + $0x20] sm:$0xff]  ;;  %v105_v19 = vld [vmem:[#allocation2 + $0x28] sm:$0xff]  ;;  %v106_v24 = vld [vmem:[#allocation2 + $0x30] sm:$0xff]  ;;  %v127_v11 = vlaneseq }
  0x63   :  { %v1946_v21 = vld [vmem:[#allocation7 + $0x44] ss:$8 sps:$4 sm:$0xff]   ;;  %v118_v22 = vpack.c.bf16 %v105_v19, %v104_v18  ;;  %v1948_v23 = vld [vmem:[#allocation7 + $0x40] ss:$8 sps:$4 sm:$0xff]   ;;  %v107_v25 = vld [vmem:[#allocation2 + $0x38] sm:$0xff] }
  0x64   :  { %1682 = vmatmul.mubr.msk.bf16.vlgmr.msra.gmra.mrb[0].mxu0 %vm142_vm1, %v116_v7  ;;  %v1949_v26 = vld [vmem:[#allocation7 + $0x54] ss:$8 sps:$4 sm:$0xff]   ;;  %v1951_v27 = vld [vmem:[#allocation7 + $0x50] ss:$8 sps:$4 sm:$0xff]   ;;  %v1952_v28 = vld [vmem:[#allocation7 + $0x64] ss:$8 sps:$4 sm:$0xff]   ;;  %v119_v29 = vpack.c.bf16 %v107_v25, %v106_v24 }
  0x65   :  { %216 = vmatprep.mubr.bf16.mxu0 %v2157_v0  ;;  %542 = vmatpush1.bf16.msra.mxu1 %v1939_v13  ;;  %v1954_v30 = vld [vmem:[#allocation7 + $0x60] ss:$8 sps:$4 sm:$0xff]   ;;  %v1955_v31 = vld [vmem:[#allocation7 + $0x74] ss:$8 sps:$4 sm:$0xff]   ;;  %v1957_v34 = vld [vmem:[#allocation7 + $0x70] ss:$8 sps:$4 sm:$0xff]  }
  0x66   :  { %543 = vmatprep.subr.bf16.mxu1 %v1940_v14  ;;  %v108_v32 = vld [vmem:[#allocation2 + $0x40] sm:$0xff]  ;;  %v109_v33 = vld [vmem:[#allocation2 + $0x48] sm:$0xff]  ;;  %v110_v39 = vld [vmem:[#allocation2 + $0x50] sm:$0xff]  ;;  %v2301_v12 = vshrl.u32 %v127_v11, 7 }
  0x67   :  { %v1958_v35 = vld [vmem:[#allocation7 + $0x84] ss:$8 sps:$4 sm:$0xff]   ;;  %v120_v36 = vpack.c.bf16 %v109_v33, %v108_v32  ;;  %v1960_v37 = vld [vmem:[#allocation7 + $0x80] ss:$8 sps:$4 sm:$0xff]   ;;  %v1961_v38 = vld [vmem:[#allocation7 + $0x94] ss:$8 sps:$4 sm:$0xff]  }
  0x68   :  { %v111_v40 = vld [vmem:[#allocation2 + $0x58] sm:$0xff]  ;;  %v1964_v42 = vld [vmem:[#allocation7 + $0xa4] ss:$8 sps:$4 sm:$0xff]   ;;  %v1966_v44 = vld [vmem:[#allocation7 + $0xa0] ss:$8 sps:$4 sm:$0xff]   ;;  %v129_v13 = vsub.s32 0, %v2301_v12 }
  0x69   :  { %544 = vmatpush1.bf16.msra.mxu1 %v1942_v16  ;;  %v1963_v41 = vld [vmem:[#allocation7 + $0x90] ss:$8 sps:$4 sm:$0xff]   ;;  %v121_v43 = vpack.c.bf16 %v111_v40, %v110_v39  ;;  %v1967_v45 = vld [vmem:[#allocation7 + $0xb4] ss:$8 sps:$4 sm:$0xff]   ;;  %v113_v47 = vld [vmem:[#allocation2 + $0x68] sm:$0xff] }
  0x6a   :  { %545 = vmatprep.subr.bf16.mxu1 %v1943_v17  ;;  %v112_v46 = vld [vmem:[#allocation2 + $0x60] sm:$0xff]  ;;  %v1970_v49 = vld [vmem:[#allocation7 + $0xc4] ss:$8 sps:$4 sm:$0xff]   ;;  %v1972_v51 = vld [vmem:[#allocation7 + $0xc0] ss:$8 sps:$4 sm:$0xff]  }
  0x6b   :  { %v1969_v48 = vld [vmem:[#allocation7 + $0xb0] ss:$8 sps:$4 sm:$0xff]   ;;  %v122_v50 = vpack.c.bf16 %v113_v47, %v112_v46  ;;  %v1973_v52 = vld [vmem:[#allocation7 + $0xd4] ss:$8 sps:$4 sm:$0xff]   ;;  %v114_v53 = vld [vmem:[#allocation2 + $0x70] sm:$0xff] }
  0x6c   :  { %1683 = vmatmul.mubr.msk.bf16.gmra.mrb[4].mxu0 %vm142_vm1, %v117_v15  ;;  %v115_v54 = vld [vmem:[#allocation2 + $0x78] sm:$0xff]  ;;  %v1976_v57 = vld [vmem:[#allocation7 + $0xe4] ss:$8 sps:$4 sm:$0xff]   ;;  %v1978_v58 = vld [vmem:[#allocation7 + $0xe0] ss:$8 sps:$4 sm:$0xff]   ;;  %v133_v15 = vsub.s32 1, %v2301_v12 }
  0x6d   :  { %226 = vmatprep.mubr.bf16.mxu0 %v2157_v0  ;;  %546 = vmatpush1.bf16.msra.mxu1 %v1945_v20  ;;  %v123_v55 = vpack.c.bf16 %v115_v54, %v114_v53  ;;  %v1975_v56 = vld [vmem:[#allocation7 + $0xd0] ss:$8 sps:$4 sm:$0xff]   ;;  %v1979_v59 = vld [vmem:[#allocation7 + $0xf4] ss:$8 sps:$4 sm:$0xff]   ;;  %v1982_v61 = vld [vmem:[#allocation8 + $0x40] sm:$0xff]  }
  0x6e   :  { %547 = vmatprep.subr.bf16.mxu1 %v1946_v21  ;;  %v1981_v60 = vld [vmem:[#allocation7 + $0xf0] ss:$8 sps:$4 sm:$0xff]   ;;  %v1983_v62 = vld [vmem:[#allocation8] sm:$0xff]   ;;  %v1984_v63 = vld [vmem:[#allocation8 + $0x48] sm:$0xff]   ;;  %1788 = vmatprep.subr.bf16.mxu0 %v1982_v61 }
  0x6f   :  { %1789 = vmatpush3.bf16.msra.mxu0 %v1983_v62  ;;  %v1986_v1 = vld [vmem:[#allocation8 + $0x50] sm:$0xff]   ;;  %v1988_v3 = vld [vmem:[#allocation8 + $0x58] sm:$0xff]   ;;  %v1990_v5 = vld [vmem:[#allocation8 + $0x60] sm:$0xff]  }
  0x70   :  { %1790 = vmatprep.subr.bf16.mxu0 %v1984_v63  ;;  %v1987_v2 = vld [vmem:[#allocation8 + $0x10] sm:$0xff]   ;;  %v1989_v4 = vld [vmem:[#allocation8 + $0x18] sm:$0xff]   ;;  %v1991_v6 = vld [vmem:[#allocation8 + $0x20] sm:$0xff]  }
  0x71   :  { %548 = vmatpush1.bf16.msra.mxu1 %v1948_v23  ;;  %v1992_v7 = vld [vmem:[#allocation8 + $0x68] sm:$0xff]   ;;  %v1994_v9 = vld [vmem:[#allocation8 + $0x70] sm:$0xff]   ;;  %v125_v14 = vld [vmem:[%s2498_s2] sm:$0x3] }
  0x72   :  { %549 = vmatprep.subr.bf16.mxu1 %v1949_v26  ;;  %v1993_v8 = vld [vmem:[#allocation8 + $0x28] sm:$0xff]   ;;  %v1995_v10 = vld [vmem:[#allocation8 + $0x30] sm:$0xff]   ;;  %v2310_v16 = vrot.slane %v125_v14, %v129_v13  ;;  %v2314_v17 = vrot.slane %v125_v14, %v133_v15 }
  0x74   :  { %1684 = vmatmul.mubr.msk.bf16.gmra.mrb[8].mxu0 %vm142_vm1, %v118_v22 }
  0x75   :  { %236 = vmatprep.mubr.bf16.mxu0 %v2157_v0  ;;  %550 = vmatpush1.bf16.msra.mxu1 %v1951_v27 }
  0x76   :  { %551 = vmatprep.subr.bf16.mxu1 %v1952_v28 }
  0x79   :  { %552 = vmatpush1.bf16.msra.mxu1 %v1954_v30 }
  0x7a   :  { %553 = vmatprep.subr.bf16.mxu1 %v1955_v31 }
  0x7c   :  { %1685 = vmatmul.mubr.msk.bf16.gmra.mrb[12].mxu0 %vm142_vm1, %v119_v29 }
  0x7d   :  { %246 = vmatprep.mubr.bf16.mxu0 %v2157_v0  ;;  %554 = vmatpush1.bf16.msra.mxu1 %v1957_v34 }
  0x7e   :  { %555 = vmatprep.subr.bf16.mxu1 %v1958_v35 }
  0x81   :  { %556 = vmatpush1.bf16.msra.mxu1 %v1960_v37 }
  0x82   :  { %557 = vmatprep.subr.bf16.mxu1 %v1961_v38 }
  0x84   :  { %1686 = vmatmul.mubr.msk.bf16.gmra.mrb[16].mxu0 %vm142_vm1, %v120_v36 }
  0x85   :  { %256 = vmatprep.mubr.bf16.mxu0 %v2157_v0  ;;  %558 = vmatpush1.bf16.msra.mxu1 %v1963_v41 }
  0x86   :  { %559 = vmatprep.subr.bf16.mxu1 %v1964_v42 }
  0x89   :  { %560 = vmatpush1.bf16.msra.mxu1 %v1966_v44 }
  0x8a   :  { %561 = vmatprep.subr.bf16.mxu1 %v1967_v45 }
  0x8c   :  { %1687 = vmatmul.mubr.msk.bf16.gmra.mrb[20].mxu0 %vm142_vm1, %v121_v43 }
  0x8d   :  { %266 = vmatprep.mubr.bf16.mxu0 %v2157_v0  ;;  %562 = vmatpush1.bf16.msra.mxu1 %v1969_v48 }
  0x8e   :  { %563 = vmatprep.subr.bf16.mxu1 %v1970_v49 }
  0x91   :  { %564 = vmatpush1.bf16.msra.mxu1 %v1972_v51 }
  0x92   :  { %565 = vmatprep.subr.bf16.mxu1 %v1973_v52 }
  0x94   :  { %1688 = vmatmul.mubr.msk.bf16.gmra.mrb[24].mxu0 %vm142_vm1, %v122_v50 }
  0x95   :  { %276 = vmatprep.mubr.bf16.mxu0 %v2157_v0  ;;  %566 = vmatpush1.bf16.msra.mxu1 %v1975_v56  ;;  %v1985_v0 = vld [vmem:[#allocation8 + $0x8] sm:$0xff]  }
  0x96   :  { %567 = vmatprep.subr.bf16.mxu1 %v1976_v57  ;;  %1791 = vmatpush3.bf16.msra.mxu0 %v1985_v0 }
  0x97   :  { %1792 = vmatprep.subr.bf16.mxu0 %v1986_v1 }
  0x99   :  { %568 = vmatpush1.bf16.msra.mxu1 %v1978_v58 }
  0x9a   :  { %569 = vmatprep.subr.bf16.mxu1 %v1979_v59  ;;  %1793 = vmatpush3.bf16.msra.mxu0 %v1987_v2 }
  0x9b   :  { %1794 = vmatprep.subr.bf16.mxu0 %v1988_v3 }
  0x9c   :  { %1689 = vmatmul.mubr.msk.bf16.gmra.mrb[28].mxu0 %vm142_vm1, %v123_v55 }
  0x9d   :  { %570 = vmatpush1.bf16.msra.mxu1 %v1981_v60 }
  0x9e   :  { %1795 = vmatpush3.bf16.msra.mxu0 %v1989_v4 }
  0x9f   :  { %1796 = vmatprep.subr.bf16.mxu0 %v1990_v5 }
  0xa2   :  { %1797 = vmatpush3.bf16.msra.mxu0 %v1991_v6 }
  0xa3   :  { %1798 = vmatprep.subr.bf16.mxu0 %v1992_v7 }
  0xa6   :  { %1799 = vmatpush3.bf16.msra.mxu0 %v1993_v8 }
  0xa7   :  { %1800 = vmatprep.subr.bf16.mxu0 %v1994_v9 }
  0xaa   :  { %1801 = vmatpush3.bf16.msra.mxu0 %v1995_v10 }
 0x137   :  { %v208_v18 = vpop.f32.mrb[0].mxu0 }
 0x138   :  { %v209_v19 = vadd.f32 %v208_v18, %v2310_v16  ;;  %v210_v20 = vpop.f32.mrb[1].mxu0 }
 0x139   :  { %v211_v21 = vadd.f32 %v210_v20, %v2314_v17  ;;  %v212_v22 = vpop.f32.mrb[2].mxu0 }
 0x13a   :  { %v213_v23 = vadd.f32 %v212_v22, %v2310_v16  ;;  %v214_v24 = vpop.f32.mrb[3].mxu0  ;;  %v287_v26 = vmax.f32 %v209_v19, 0.0 }
 0x13b   :  { %v215_v25 = vadd.f32 %v214_v24, %v2314_v17  ;;  %v288_v28 = vmax.f32 %v211_v21, 0.0 }
 0x13c   :  { %v289_v27 = vmax.f32 %v213_v23, 0.0 }
 0x13d   :  { %v290_v29 = vmax.f32 %v215_v25, 0.0 }
 0x13e   :  { %v319_v30 = vpack.c.bf16 %v289_v27, %v287_v26 }
 0x13f   :  { %v218_v31 = vpop.f32.mrb[4].mxu0  ;;  %v320_v32 = vpack.c.bf16 %v290_v29, %v288_v28 }
 0x140   :  { %v219_v33 = vadd.f32 %v218_v31, %v2310_v16  ;;  %v220_v34 = vpop.f32.mrb[5].mxu0 }
 0x141   :  { %v221_v35 = vadd.f32 %v220_v34, %v2314_v17  ;;  %v222_v36 = vpop.f32.mrb[6].mxu0  ;;  %571 = vmatprep.mubr.bf16.mxu1 %v320_v32 }
 0x142   :  { %v223_v37 = vadd.f32 %v222_v36, %v2310_v16  ;;  %v224_v38 = vpop.f32.mrb[7].mxu0  ;;  %572 = vmatmul.mubr.bf16.vlgmr.msra.gmra.mrb[0].mxu1 %v319_v30  ;;  %v291_v40 = vmax.f32 %v219_v33, 0.0 }
 0x143   :  { %v225_v39 = vadd.f32 %v224_v38, %v2314_v17  ;;  %v292_v42 = vmax.f32 %v221_v35, 0.0 }
 0x144   :  { %v293_v41 = vmax.f32 %v223_v37, 0.0 }
 0x145   :  { %v294_v43 = vmax.f32 %v225_v39, 0.0 }
 0x146   :  { %v321_v44 = vpack.c.bf16 %v293_v41, %v291_v40 }
 0x147   :  { %v322_v45 = vpack.c.bf16 %v294_v43, %v292_v42  ;;  %v228_v46 = vpop.f32.mrb[8].mxu0 }
 0x148   :  { %v229_v47 = vadd.f32 %v228_v46, %v2310_v16  ;;  %v230_v48 = vpop.f32.mrb[9].mxu0 }
 0x149   :  { %v231_v49 = vadd.f32 %v230_v48, %v2314_v17  ;;  %v232_v50 = vpop.f32.mrb[10].mxu0  ;;  %581 = vmatprep.mubr.bf16.mxu1 %v322_v45 }
 0x14a   :  { %v233_v51 = vadd.f32 %v232_v50, %v2310_v16  ;;  %v234_v52 = vpop.f32.mrb[11].mxu0  ;;  %582 = vmatmul.mubr.bf16.gmra.mrb[4].mxu1 %v321_v44  ;;  %v295_v54 = vmax.f32 %v229_v47, 0.0 }
 0x14b   :  { %v235_v53 = vadd.f32 %v234_v52, %v2314_v17  ;;  %v296_v56 = vmax.f32 %v231_v49, 0.0 }
 0x14c   :  { %v297_v55 = vmax.f32 %v233_v51, 0.0 }
 0x14d   :  { %v298_v57 = vmax.f32 %v235_v53, 0.0 }
 0x14e   :  { %v323_v58 = vpack.c.bf16 %v297_v55, %v295_v54 }
 0x14f   :  { %v324_v59 = vpack.c.bf16 %v298_v57, %v296_v56  ;;  %v238_v60 = vpop.f32.mrb[12].mxu0 }
 0x150   :  { %v239_v61 = vadd.f32 %v238_v60, %v2310_v16  ;;  %v240_v62 = vpop.f32.mrb[13].mxu0 }
 0x151   :  { %v241_v63 = vadd.f32 %v240_v62, %v2314_v17  ;;  %v242_v0 = vpop.f32.mrb[14].mxu0  ;;  %591 = vmatprep.mubr.bf16.mxu1 %v324_v59 }
 0x152   :  { %v243_v1 = vadd.f32 %v242_v0, %v2310_v16  ;;  %v244_v2 = vpop.f32.mrb[15].mxu0  ;;  %592 = vmatmul.mubr.bf16.gmra.mrb[8].mxu1 %v323_v58  ;;  %v299_v4 = vmax.f32 %v239_v61, 0.0 }
 0x153   :  { %v245_v3 = vadd.f32 %v244_v2, %v2314_v17  ;;  %v300_v6 = vmax.f32 %v241_v63, 0.0 }
 0x154   :  { %v301_v5 = vmax.f32 %v243_v1, 0.0 }
 0x155   :  { %v302_v7 = vmax.f32 %v245_v3, 0.0 }
 0x156   :  { %v325_v8 = vpack.c.bf16 %v301_v5, %v299_v4 }
 0x157   :  { %v326_v9 = vpack.c.bf16 %v302_v7, %v300_v6  ;;  %v248_v10 = vpop.f32.mrb[16].mxu0  ;;  %v1996_v7 = vld [vmem:[#allocation8 + $0x78] sm:$0xff]  }
 0x158   :  { %v249_v11 = vadd.f32 %v248_v10, %v2310_v16  ;;  %v250_v14 = vpop.f32.mrb[17].mxu0  ;;  %1802 = vmatprep.subr.bf16.mxu0 %v1996_v7  ;;  %v2000_v10 = vld [vmem:[#allocation10 + $0x10] sm:$0xff]  }
 0x159   :  { %v251_v18 = vadd.f32 %v250_v14, %v2314_v17  ;;  %v252_v19 = vpop.f32.mrb[18].mxu0  ;;  %601 = vmatprep.mubr.bf16.mxu1 %v326_v9  ;;  %v1998_v9 = vld [vmem:[#allocation10] sm:$0xff]  }
 0x15a   :  { %v253_v20 = vadd.f32 %v252_v19, %v2310_v16  ;;  %v254_v21 = vpop.f32.mrb[19].mxu0  ;;  %602 = vmatmul.mubr.bf16.gmra.mrb[12].mxu1 %v325_v8  ;;  %v303_v23 = vmax.f32 %v249_v11, 0.0  ;;  %v1997_v8 = vld [vmem:[#allocation8 + $0x38] sm:$0xff]   ;;  %1900 = vmatprep.subr.bf16.mxu1 %v1998_v9 }
 0x15b   :  { %v255_v22 = vadd.f32 %v254_v21, %v2314_v17  ;;  %v304_v25 = vmax.f32 %v251_v18, 0.0  ;;  %1803 = vmatpush3.bf16.msra.mxu0 %v1997_v8  ;;  %1908 = vmatpush3.bf16.msra.mxu1 %v1998_v9 }
 0x15c   :  { %v305_v24 = vmax.f32 %v253_v20, 0.0  ;;  %1868 = vmatprep.subr.bf16.mxu0 %v1998_v9 }
 0x15d   :  { %v306_v26 = vmax.f32 %v255_v22, 0.0 }
 0x15e   :  { %v327_v27 = vpack.c.bf16 %v305_v24, %v303_v23 }
 0x15f   :  { %v328_v28 = vpack.c.bf16 %v306_v26, %v304_v25  ;;  %v258_v29 = vpop.f32.mrb[20].mxu0 }
 0x160   :  { %v259_v30 = vadd.f32 %v258_v29, %v2310_v16  ;;  %v260_v31 = vpop.f32.mrb[21].mxu0 }
 0x161   :  { %v261_v32 = vadd.f32 %v260_v31, %v2314_v17  ;;  %v262_v33 = vpop.f32.mrb[22].mxu0  ;;  %611 = vmatprep.mubr.bf16.mxu1 %v328_v28 }
 0x162   :  { %v263_v34 = vadd.f32 %v262_v33, %v2310_v16  ;;  %v264_v35 = vpop.f32.mrb[23].mxu0  ;;  %612 = vmatmul.mubr.bf16.gmra.mrb[16].mxu1 %v327_v27  ;;  %v307_v37 = vmax.f32 %v259_v30, 0.0 }
 0x163   :  { %v265_v36 = vadd.f32 %v264_v35, %v2314_v17  ;;  %v308_v39 = vmax.f32 %v261_v32, 0.0 }
 0x164   :  { %v309_v38 = vmax.f32 %v263_v34, 0.0 }
 0x165   :  { %v310_v40 = vmax.f32 %v265_v36, 0.0 }
 0x166   :  { %v329_v41 = vpack.c.bf16 %v309_v38, %v307_v37 }
 0x167   :  { %v330_v42 = vpack.c.bf16 %v310_v40, %v308_v39  ;;  %v268_v43 = vpop.f32.mrb[24].mxu0 }
 0x168   :  { %v269_v44 = vadd.f32 %v268_v43, %v2310_v16  ;;  %v270_v45 = vpop.f32.mrb[25].mxu0 }
 0x169   :  { %v271_v46 = vadd.f32 %v270_v45, %v2314_v17  ;;  %v272_v47 = vpop.f32.mrb[26].mxu0  ;;  %621 = vmatprep.mubr.bf16.mxu1 %v330_v42 }
 0x16a   :  { %v273_v48 = vadd.f32 %v272_v47, %v2310_v16  ;;  %v274_v49 = vpop.f32.mrb[27].mxu0  ;;  %622 = vmatmul.mubr.bf16.gmra.mrb[20].mxu1 %v329_v41  ;;  %v311_v51 = vmax.f32 %v269_v44, 0.0 }
 0x16b   :  { %v275_v50 = vadd.f32 %v274_v49, %v2314_v17  ;;  %v312_v53 = vmax.f32 %v271_v46, 0.0 }
 0x16c   :  { %v313_v52 = vmax.f32 %v273_v48, 0.0 }
 0x16d   :  { %v314_v54 = vmax.f32 %v275_v50, 0.0 }
 0x16e   :  { %v331_v55 = vpack.c.bf16 %v313_v52, %v311_v51 }
 0x16f   :  { %v332_v56 = vpack.c.bf16 %v314_v54, %v312_v53  ;;  %v278_v57 = vpop.f32.mrb[28].mxu0 }
 0x170   :  { %v279_v58 = vadd.f32 %v278_v57, %v2310_v16  ;;  %v280_v59 = vpop.f32.mrb[29].mxu0 }
 0x171   :  { %v281_v60 = vadd.f32 %v280_v59, %v2314_v17  ;;  %v282_v61 = vpop.f32.mrb[30].mxu0  ;;  %631 = vmatprep.mubr.bf16.mxu1 %v332_v56 }
 0x172   :  { %v283_v62 = vadd.f32 %v282_v61, %v2310_v16  ;;  %v284_v63 = vpop.f32.mrb[31].mxu0  ;;  %632 = vmatmul.mubr.bf16.gmra.mrb[24].mxu1 %v331_v55  ;;  %v315_v1 = vmax.f32 %v279_v58, 0.0  ;;  %v1999_v16 = vld [vmem:[#allocation10 + $0x8] sm:$0xff]  }
 0x173   :  { %v285_v0 = vadd.f32 %v284_v63, %v2314_v17  ;;  %v316_v3 = vmax.f32 %v281_v60, 0.0  ;;  %1901 = vmatprep.subr.bf16.mxu1 %v1999_v16  ;;  %v367_v17 = vld [vmem:[%s2500_s4] sm:$0x3] }
 0x174   :  { %v317_v2 = vmax.f32 %v283_v62, 0.0  ;;  %1909 = vmatpush3.bf16.msra.mxu1 %v1999_v16  ;;  %v2353_v11 = vrot.slane %v367_v17, %v129_v13  ;;  %v2357_v14 = vrot.slane %v367_v17, %v133_v15 }
 0x175   :  { %v318_v4 = vmax.f32 %v285_v0, 0.0  ;;  %1902 = vmatprep.subr.bf16.mxu1 %v2000_v10 }
 0x176   :  { %v333_v5 = vpack.c.bf16 %v317_v2, %v315_v1 }
 0x177   :  { %v334_v6 = vpack.c.bf16 %v318_v4, %v316_v3 }
 0x178   :  { %1910 = vmatpush3.bf16.msra.mxu1 %v2000_v10 }
 0x179   :  { %641 = vmatprep.mubr.bf16.mxu1 %v334_v6 }
 0x17a   :  { %642 = vmatmul.mubr.bf16.gmra.mrb[28].mxu1 %v333_v5 }
 0x215   :  { %v573_v18 = vpop.f32.mrb[0].mxu1 }
 0x216   :  { %v574_v19 = vadd.f32 %v573_v18, %v2353_v11  ;;  %v575_v20 = vpop.f32.mrb[1].mxu1 }
 0x217   :  { %v576_v21 = vadd.f32 %v575_v20, %v2357_v14  ;;  %v577_v22 = vpop.f32.mrb[2].mxu1 }
 0x218   :  { %v578_v23 = vadd.f32 %v577_v22, %v2353_v11  ;;  %v579_v24 = vpop.f32.mrb[3].mxu1  ;;  %v652_v26 = vmax.f32 %v574_v19, 0.0 }
 0x219   :  { %v580_v25 = vadd.f32 %v579_v24, %v2357_v14  ;;  %v653_v13 = vmax.f32 %v576_v21, 0.0 }
 0x21a   :  { %v654_v27 = vmax.f32 %v578_v23, 0.0 }
 0x21b   :  { %v655_v28 = vmax.f32 %v580_v25, 0.0 }
 0x21c   :  { %v684_v29 = vpack.c.bf16 %v654_v27, %v652_v26 }
 0x21d   :  { %v685_v30 = vpack.c.bf16 %v655_v28, %v653_v13  ;;  %v583_v15 = vpop.f32.mrb[4].mxu1 }
 0x21e   :  { %v584_v31 = vadd.f32 %v583_v15, %v2353_v11  ;;  %v585_v32 = vpop.f32.mrb[5].mxu1 }
 0x21f   :  { %v586_v33 = vadd.f32 %v585_v32, %v2357_v14  ;;  %v587_v34 = vpop.f32.mrb[6].mxu1  ;;  %867 = vmatprep.mubr.bf16.mxu0 %v685_v30 }
 0x220   :  { %v588_v35 = vadd.f32 %v587_v34, %v2353_v11  ;;  %v589_v36 = vpop.f32.mrb[7].mxu1  ;;  %868 = vmatmul.mubr.bf16.vlgmr.msra.gmra.mrb[32].mxu0 %v684_v29  ;;  %v656_v38 = vmax.f32 %v584_v31, 0.0 }
 0x221   :  { %v590_v37 = vadd.f32 %v589_v36, %v2357_v14  ;;  %1869 = vmatpush3.bf16.msra.mxu0 %v1998_v9  ;;  %v657_v40 = vmax.f32 %v586_v33, 0.0 }
 0x222   :  { %v658_v39 = vmax.f32 %v588_v35, 0.0  ;;  %1870 = vmatprep.subr.bf16.mxu0 %v1999_v16 }
 0x223   :  { %v659_v41 = vmax.f32 %v590_v37, 0.0 }
 0x224   :  { %v686_v42 = vpack.c.bf16 %v658_v39, %v656_v38 }
 0x225   :  { %v687_v43 = vpack.c.bf16 %v659_v41, %v657_v40  ;;  %v593_v44 = vpop.f32.mrb[8].mxu1  ;;  %1871 = vmatpush3.bf16.msra.mxu0 %v1999_v16 }
 0x226   :  { %v594_v45 = vadd.f32 %v593_v44, %v2353_v11  ;;  %v595_v46 = vpop.f32.mrb[9].mxu1  ;;  %1872 = vmatprep.subr.bf16.mxu0 %v2000_v10 }
 0x227   :  { %v596_v47 = vadd.f32 %v595_v46, %v2357_v14  ;;  %v597_v48 = vpop.f32.mrb[10].mxu1  ;;  %875 = vmatprep.mubr.bf16.mxu0 %v687_v43 }
 0x228   :  { %v598_v49 = vadd.f32 %v597_v48, %v2353_v11  ;;  %v599_v50 = vpop.f32.mrb[11].mxu1  ;;  %876 = vmatmul.mubr.bf16.gmra.mrb[36].mxu0 %v686_v42  ;;  %v660_v52 = vmax.f32 %v594_v45, 0.0 }
 0x229   :  { %v600_v51 = vadd.f32 %v599_v50, %v2357_v14  ;;  %1873 = vmatpush3.bf16.msra.mxu0 %v2000_v10  ;;  %v661_v54 = vmax.f32 %v596_v47, 0.0 }
 0x22a   :  { %v662_v53 = vmax.f32 %v598_v49, 0.0 }
 0x22b   :  { %v663_v55 = vmax.f32 %v600_v51, 0.0 }
 0x22c   :  { %v688_v56 = vpack.c.bf16 %v662_v53, %v660_v52 }
 0x22d   :  { %v689_v57 = vpack.c.bf16 %v663_v55, %v661_v54  ;;  %v603_v58 = vpop.f32.mrb[12].mxu1 }
 0x22e   :  { %v604_v59 = vadd.f32 %v603_v58, %v2353_v11  ;;  %v605_v60 = vpop.f32.mrb[13].mxu1 }
 0x22f   :  { %v606_v61 = vadd.f32 %v605_v60, %v2357_v14  ;;  %v607_v62 = vpop.f32.mrb[14].mxu1  ;;  %883 = vmatprep.mubr.bf16.mxu0 %v689_v57 }
 0x230   :  { %v608_v63 = vadd.f32 %v607_v62, %v2353_v11  ;;  %v609_v0 = vpop.f32.mrb[15].mxu1  ;;  %884 = vmatmul.mubr.bf16.gmra.mrb[40].mxu0 %v688_v56  ;;  %v664_v2 = vmax.f32 %v604_v59, 0.0 }
 0x231   :  { %v610_v1 = vadd.f32 %v609_v0, %v2357_v14  ;;  %v665_v4 = vmax.f32 %v606_v61, 0.0 }
 0x232   :  { %v666_v3 = vmax.f32 %v608_v63, 0.0 }
 0x233   :  { %v667_v5 = vmax.f32 %v610_v1, 0.0 }
 0x234   :  { %v690_v6 = vpack.c.bf16 %v666_v3, %v664_v2  ;;  %v2001_v3 = vld [vmem:[#allocation10 + $0x18] sm:$0xff]  }
 0x235   :  { %v691_v7 = vpack.c.bf16 %v667_v5, %v665_v4  ;;  %v613_v8 = vpop.f32.mrb[16].mxu1  ;;  %1874 = vmatprep.subr.bf16.mxu0 %v2001_v3  ;;  %1903 = vmatprep.subr.bf16.mxu1 %v2001_v3  ;;  %v2002_v4 = vld [vmem:[#allocation10 + $0x20] sm:$0xff]   ;;  %v2005_v5 = vld [vmem:[#allocation10 + $0x38] sm:$0xff]  }
 0x236   :  { %v614_v9 = vadd.f32 %v613_v8, %v2353_v11  ;;  %v615_v16 = vpop.f32.mrb[17].mxu1  ;;  %1875 = vmatpush3.bf16.msra.mxu0 %v2001_v3  ;;  %1911 = vmatpush3.bf16.msra.mxu1 %v2001_v3 }
 0x237   :  { %v616_v10 = vadd.f32 %v615_v16, %v2357_v14  ;;  %v617_v17 = vpop.f32.mrb[18].mxu1  ;;  %891 = vmatprep.mubr.bf16.mxu0 %v691_v7  ;;  %1876 = vmatprep.subr.bf16.mxu0 %v2002_v4  ;;  %v2394_v7 = vld [vmem:[%s2502_s6] ss:$0 sm:$0xff] }
 0x238   :  { %v618_v18 = vadd.f32 %v617_v17, %v2353_v11  ;;  %v619_v19 = vpop.f32.mrb[19].mxu1  ;;  %892 = vmatmul.mubr.bf16.gmra.mrb[44].mxu0 %v690_v6  ;;  %v668_v21 = vmax.f32 %v614_v9, 0.0  ;;  %1904 = vmatprep.subr.bf16.mxu1 %v2002_v4 }
 0x239   :  { %v620_v20 = vadd.f32 %v619_v19, %v2357_v14  ;;  %v669_v23 = vmax.f32 %v616_v10, 0.0 }
 0x23a   :  { %v670_v22 = vmax.f32 %v618_v18, 0.0  ;;  %1877 = vmatpush3.bf16.msra.mxu0 %v2002_v4  ;;  %1912 = vmatpush3.bf16.msra.mxu1 %v2002_v4 }
 0x23b   :  { %v671_v24 = vmax.f32 %v620_v20, 0.0 }
 0x23c   :  { %v692_v25 = vpack.c.bf16 %v670_v22, %v668_v21 }
 0x23d   :  { %v693_v26 = vpack.c.bf16 %v671_v24, %v669_v23  ;;  %v623_v27 = vpop.f32.mrb[20].mxu1 }
 0x23e   :  { %v624_v13 = vadd.f32 %v623_v27, %v2353_v11  ;;  %v625_v28 = vpop.f32.mrb[21].mxu1 }
 0x23f   :  { %v626_v29 = vadd.f32 %v625_v28, %v2357_v14  ;;  %v627_v30 = vpop.f32.mrb[22].mxu1  ;;  %899 = vmatprep.mubr.bf16.mxu0 %v693_v26 }
 0x240   :  { %v628_v15 = vadd.f32 %v627_v30, %v2353_v11  ;;  %v629_v31 = vpop.f32.mrb[23].mxu1  ;;  %900 = vmatmul.mubr.bf16.gmra.mrb[48].mxu0 %v692_v25  ;;  %v672_v33 = vmax.f32 %v624_v13, 0.0 }
 0x241   :  { %v630_v32 = vadd.f32 %v629_v31, %v2357_v14  ;;  %v673_v35 = vmax.f32 %v626_v29, 0.0 }
 0x242   :  { %v674_v34 = vmax.f32 %v628_v15, 0.0 }
 0x243   :  { %v675_v36 = vmax.f32 %v630_v32, 0.0 }
 0x244   :  { %v694_v37 = vpack.c.bf16 %v674_v34, %v672_v33 }
 0x245   :  { %v695_v38 = vpack.c.bf16 %v675_v36, %v673_v35  ;;  %v633_v39 = vpop.f32.mrb[24].mxu1 }
 0x246   :  { %v634_v40 = vadd.f32 %v633_v39, %v2353_v11  ;;  %v635_v41 = vpop.f32.mrb[25].mxu1 }
 0x247   :  { %v636_v42 = vadd.f32 %v635_v41, %v2357_v14  ;;  %v637_v43 = vpop.f32.mrb[26].mxu1  ;;  %907 = vmatprep.mubr.bf16.mxu0 %v695_v38 }
 0x248   :  { %v638_v44 = vadd.f32 %v637_v43, %v2353_v11  ;;  %v639_v45 = vpop.f32.mrb[27].mxu1  ;;  %908 = vmatmul.mubr.bf16.gmra.mrb[52].mxu0 %v694_v37  ;;  %v676_v47 = vmax.f32 %v634_v40, 0.0 }
 0x249   :  { %v640_v46 = vadd.f32 %v639_v45, %v2357_v14  ;;  %v677_v49 = vmax.f32 %v636_v42, 0.0 }
 0x24a   :  { %v678_v48 = vmax.f32 %v638_v44, 0.0 }
 0x24b   :  { %v679_v50 = vmax.f32 %v640_v46, 0.0 }
 0x24c   :  { %v696_v51 = vpack.c.bf16 %v678_v48, %v676_v47 }
 0x24d   :  { %v697_v52 = vpack.c.bf16 %v679_v50, %v677_v49  ;;  %v643_v53 = vpop.f32.mrb[28].mxu1 }
 0x24e   :  { %v644_v54 = vadd.f32 %v643_v53, %v2353_v11  ;;  %v645_v55 = vpop.f32.mrb[29].mxu1 }
 0x24f   :  { %v646_v56 = vadd.f32 %v645_v55, %v2357_v14  ;;  %v647_v57 = vpop.f32.mrb[30].mxu1  ;;  %915 = vmatprep.mubr.bf16.mxu0 %v697_v52 }
 0x250   :  { %v648_v58 = vadd.f32 %v647_v57, %v2353_v11  ;;  %v649_v59 = vpop.f32.mrb[31].mxu1  ;;  %916 = vmatmul.mubr.bf16.gmra.mrb[56].mxu0 %v696_v51  ;;  %v680_v61 = vmax.f32 %v644_v54, 0.0  ;;  %v2003_v11 = vld [vmem:[#allocation10 + $0x28] sm:$0xff]  }
 0x251   :  { %v650_v60 = vadd.f32 %v649_v59, %v2357_v14  ;;  %v681_v63 = vmax.f32 %v646_v56, 0.0  ;;  %1878 = vmatprep.subr.bf16.mxu0 %v2003_v11  ;;  %1905 = vmatprep.subr.bf16.mxu1 %v2003_v11  ;;  %v2004_v14 = vld [vmem:[#allocation10 + $0x30] sm:$0xff]  }
 0x252   :  { %v682_v62 = vmax.f32 %v648_v58, 0.0  ;;  %1879 = vmatpush3.bf16.msra.mxu0 %v2003_v11  ;;  %1913 = vmatpush3.bf16.msra.mxu1 %v2003_v11 }
 0x253   :  { %v683_v0 = vmax.f32 %v650_v60, 0.0  ;;  %1880 = vmatprep.subr.bf16.mxu0 %v2004_v14  ;;  %1906 = vmatprep.subr.bf16.mxu1 %v2004_v14 }
 0x254   :  { %v698_v1 = vpack.c.bf16 %v682_v62, %v680_v61 }
 0x255   :  { %v699_v2 = vpack.c.bf16 %v683_v0, %v681_v63 }
 0x256   :  { %1881 = vmatpush3.bf16.msra.mxu0 %v2004_v14  ;;  %1914 = vmatpush3.bf16.msra.mxu1 %v2004_v14 }
 0x257   :  { %923 = vmatprep.mubr.bf16.mxu0 %v699_v2  ;;  %1882 = vmatprep.subr.bf16.mxu0 %v2005_v5 }
 0x258   :  { %924 = vmatmul.mubr.bf16.gmra.mrb[60].mxu0 %v698_v1  ;;  %1907 = vmatprep.subr.bf16.mxu1 %v2005_v5 }
 0x25a   :  { %1883 = vmatpush3.bf16.msra.mxu0 %v2005_v5  ;;  %1915 = vmatpush3.bf16.msra.mxu1 %v2005_v5 }
 0x2f3   :  { %v1804_v6 = vpop.f32.mrb[32].mxu0 }
 0x2f4   :  { %v1805_v8 = vpop.f32.mrb[33].mxu0 }
 0x2f5   :  { %v1806_v9 = vadd.f32 %v1805_v8, %v1804_v6  ;;  %v1807_v16 = vpop.f32.mrb[34].mxu0 }
 0x2f6   :  { %v1808_v10 = vpop.f32.mrb[35].mxu0 }
 0x2f7   :  { %v870_v17 = vadd.f32 %v1806_v9, %v2394_v7  ;;  %v1809_v18 = vadd.f32 %v1808_v10, %v1807_v16 }
 0x2f9   :  { %v873_v19 = vadd.f32 %v1809_v18, %v2394_v7  ;;  %v932_v20 = vmax.f32 %v870_v17, 0.0 }
 0x2fb   :  { %v933_v21 = vmax.f32 %v873_v19, 0.0  ;;  %v1810_v22 = vpop.f32.mrb[36].mxu0 }
 0x2fc   :  { %v1811_v23 = vpop.f32.mrb[37].mxu0 }
 0x2fd   :  { %v1812_v24 = vadd.f32 %v1811_v23, %v1810_v22  ;;  %v1813_v25 = vpop.f32.mrb[38].mxu0  ;;  %v948_v26 = vpack.c.bf16 %v933_v21, %v932_v20 }
 0x2fe   :  { %v1814_v27 = vpop.f32.mrb[39].mxu0 }
 0x2ff   :  { %v878_v13 = vadd.f32 %v1812_v24, %v2394_v7  ;;  %v1815_v28 = vadd.f32 %v1814_v27, %v1813_v25  ;;  %1884 = vmatprep.mubr.bf16.mxu0 %v948_v26 }
 0x301   :  { %v881_v29 = vadd.f32 %v1815_v28, %v2394_v7  ;;  %v934_v30 = vmax.f32 %v878_v13, 0.0 }
 0x303   :  { %v935_v15 = vmax.f32 %v881_v29, 0.0  ;;  %v1816_v31 = vpop.f32.mrb[40].mxu0 }
 0x304   :  { %v1817_v32 = vpop.f32.mrb[41].mxu0 }
 0x305   :  { %v949_v33 = vpack.c.bf16 %v935_v15, %v934_v30  ;;  %v1818_v34 = vadd.f32 %v1817_v32, %v1816_v31  ;;  %v1819_v35 = vpop.f32.mrb[42].mxu0 }
 0x306   :  { %v1820_v36 = vpop.f32.mrb[43].mxu0 }
 0x307   :  { %v886_v37 = vadd.f32 %v1818_v34, %v2394_v7  ;;  %v1821_v38 = vadd.f32 %v1820_v36, %v1819_v35  ;;  %1885 = vmatmul.mubr.bf16.vlgmr.msra.gmra.mrb[64].mxu0 %v949_v33  ;;  %v2158_v36 = vmov 1966171168  }
 0x309   :  { %v889_v39 = vadd.f32 %v1821_v38, %v2394_v7  ;;  %v936_v40 = vmax.f32 %v886_v37, 0.0  ;;  %v1142_v37 = vunpack.c.l.s4 %v2158_v36 }
 0x30b   :  { %v937_v41 = vmax.f32 %v889_v39, 0.0  ;;  %v1822_v42 = vpop.f32.mrb[44].mxu0  ;;  %v1143_v38 = vunpack.c.0.s8 %v1142_v37 }
 0x30c   :  { %v1823_v43 = vpop.f32.mrb[45].mxu0 }
 0x30d   :  { %v1824_v44 = vadd.f32 %v1823_v43, %v1822_v42  ;;  %v1825_v45 = vpop.f32.mrb[46].mxu0  ;;  %v950_v46 = vpack.c.bf16 %v937_v41, %v936_v40  ;;  %v2415_v40 = vld [vmem:[%s2504_s8] ss:$0 sm:$0xff]  ;;  %v2418_v43 = vsub.s32 %v1143_v38, %v2301_v12 }
 0x30e   :  { %v1826_v47 = vpop.f32.mrb[47].mxu0 }
 0x30f   :  { %v894_v48 = vadd.f32 %v1824_v44, %v2394_v7  ;;  %v1827_v49 = vadd.f32 %v1826_v47, %v1825_v45  ;;  %1888 = vmatprep.mubr.bf16.mxu1 %v950_v46 }
 0x311   :  { %v897_v50 = vadd.f32 %v1827_v49, %v2394_v7  ;;  %v938_v51 = vmax.f32 %v894_v48, 0.0 }
 0x313   :  { %v939_v52 = vmax.f32 %v897_v50, 0.0  ;;  %v1828_v53 = vpop.f32.mrb[48].mxu0 }
 0x314   :  { %v1829_v54 = vpop.f32.mrb[49].mxu0 }
 0x315   :  { %v951_v55 = vpack.c.bf16 %v939_v52, %v938_v51  ;;  %v1830_v56 = vadd.f32 %v1829_v54, %v1828_v53  ;;  %v1831_v57 = vpop.f32.mrb[50].mxu0 }
 0x316   :  { %v1832_v58 = vpop.f32.mrb[51].mxu0 }
 0x317   :  { %v902_v59 = vadd.f32 %v1830_v56, %v2394_v7  ;;  %v1833_v60 = vadd.f32 %v1832_v58, %v1831_v57  ;;  %1889 = vmatmul.mubr.bf16.vlgmr.msra.gmra.mrb[32].mxu1 %v951_v55 }
 0x319   :  { %v905_v61 = vadd.f32 %v1833_v60, %v2394_v7  ;;  %v940_v62 = vmax.f32 %v902_v59, 0.0 }
 0x31b   :  { %v941_v63 = vmax.f32 %v905_v61, 0.0  ;;  %v1834_v0 = vpop.f32.mrb[52].mxu0 }
 0x31c   :  { %v1835_v1 = vpop.f32.mrb[53].mxu0 }
 0x31d   :  { %v1836_v2 = vadd.f32 %v1835_v1, %v1834_v0  ;;  %v1837_v3 = vpop.f32.mrb[54].mxu0  ;;  %v952_v4 = vpack.c.bf16 %v941_v63, %v940_v62 }
 0x31e   :  { %v1838_v11 = vpop.f32.mrb[55].mxu0 }
 0x31f   :  { %v910_v14 = vadd.f32 %v1836_v2, %v2394_v7  ;;  %v1839_v5 = vadd.f32 %v1838_v11, %v1837_v3  ;;  %1892 = vmatprep.mubr.bf16.mxu1 %v952_v4 }
 0x321   :  { %v913_v6 = vadd.f32 %v1839_v5, %v2394_v7  ;;  %v942_v8 = vmax.f32 %v910_v14, 0.0 }
 0x323   :  { %v943_v9 = vmax.f32 %v913_v6, 0.0  ;;  %v1840_v16 = vpop.f32.mrb[56].mxu0 }
 0x324   :  { %v1841_v10 = vpop.f32.mrb[57].mxu0 }
 0x325   :  { %v1842_v17 = vadd.f32 %v1841_v10, %v1840_v16  ;;  %v1843_v18 = vpop.f32.mrb[58].mxu0  ;;  %v953_v19 = vpack.c.bf16 %v943_v9, %v942_v8 }
 0x326   :  { %v1844_v20 = vpop.f32.mrb[59].mxu0 }
 0x327   :  { %v918_v21 = vadd.f32 %v1842_v17, %v2394_v7  ;;  %v1845_v22 = vadd.f32 %v1844_v20, %v1843_v18  ;;  %1893 = vmatmul.mubr.bf16.gmra.mrb[36].mxu1 %v953_v19 }
 0x329   :  { %v921_v23 = vadd.f32 %v1845_v22, %v2394_v7  ;;  %v944_v24 = vmax.f32 %v918_v21, 0.0 }
 0x32b   :  { %v945_v25 = vmax.f32 %v921_v23, 0.0  ;;  %v1846_v26 = vpop.f32.mrb[60].mxu0 }
 0x32c   :  { %v1847_v27 = vpop.f32.mrb[61].mxu0 }
 0x32d   :  { %v1848_v13 = vadd.f32 %v1847_v27, %v1846_v26  ;;  %v1849_v28 = vpop.f32.mrb[62].mxu0  ;;  %v954_v29 = vpack.c.bf16 %v945_v25, %v944_v24 }
 0x32e   :  { %v1850_v30 = vpop.f32.mrb[63].mxu0 }
 0x32f   :  { %v926_v15 = vadd.f32 %v1848_v13, %v2394_v7  ;;  %v1851_v31 = vadd.f32 %v1850_v30, %v1849_v28  ;;  %1896 = vmatprep.mubr.bf16.mxu1 %v954_v29 }
 0x331   :  { %v929_v32 = vadd.f32 %v1851_v31, %v2394_v7  ;;  %v946_v33 = vmax.f32 %v926_v15, 0.0 }
 0x333   :  { %v947_v34 = vmax.f32 %v929_v32, 0.0 }
 0x335   :  { %v955_v35 = vpack.c.bf16 %v947_v34, %v946_v33 }
 0x337   :  { %1897 = vmatmul.mubr.bf16.gmra.mrb[40].mxu1 %v955_v35 }
 0x3da   :  { %v1886_v39 = vpop.f32.mrb[64].mxu0 }
 0x3db   :  { %v1061_v41 = vpop.f32.mrb[65].mxu0  ;;  %v1070_v7 = vadd.f32 %v1886_v39, %v2415_v40 }
 0x3dc   :  { %v1887_v42 = vpop.f32.mrb[66].mxu0  ;;  %v1062_v46 = vadd.f32 %v2415_v40, %v1061_v41 }
 0x3dd   :  { %v1073_v44 = vadd.f32 %v1887_v42, %v2415_v40  ;;  %v1064_v45 = vpop.f32.mrb[67].mxu0 }
 0x3de   :  { %v1065_v47 = vadd.f32 %v2415_v40, %v1064_v45 }
 0x3df   :  { %v1125_v48 = vpack.c.bf16 %v1073_v44, %v1070_v7  ;;  %v1749_v49 = vpack.c.bf16 %v1073_v44, %v1073_v44 }
 0x3e0   :  { %v1124_v50 = vpack.c.bf16 %v1065_v47, %v1062_v46  ;;  %v1748_v51 = vpack.c.bf16 %v1065_v47, %v1065_v47 }
 0x3e1   :  { %v1196_v52 = vrot.slane %v1125_v48, %v2418_v43  ;;  %v1203_v53 = vrot.slane %v1749_v49, %v2418_v43 }
 0x3e2   :  { %v1147_v12 = vrot.slane %v1124_v50, %v2418_v43  ;;  %v1154_v54 = vrot.slane %v1748_v51, %v2418_v43 }
 0x3e3   :  { %v1204_v55 = vcombine.high %v1196_v52, %v1196_v52  ;;  %v1205_v56 = vcombine.high %v1203_v53, %v1203_v53  ;;  %v1212_v57 = vrot.slane %v1196_v52, %v2418_v43  ;;  %v1219_v58 = vrot.slane %v1203_v53, %v2418_v43  ;;  %1760 = vst.sshfl [vmem:[#allocation11 + $0x8] sm:$0x1 pattern:$0x73625140] %v1196_v52 }
 0x3e4   :  { %1762 = vst.sshfl [vmem:[#allocation11 + $0xc] sm:$0x1 pattern:$0x73625140] %v1203_v53  ;;  %v1155_v59 = vcombine.high %v1147_v12, %v1147_v12  ;;  %v1156_v60 = vcombine.high %v1154_v54, %v1154_v54  ;;  %v1163_v61 = vrot.slane %v1147_v12, %v2418_v43  ;;  %v1170_v62 = vrot.slane %v1154_v54, %v2418_v43 }
 0x3e5   :  { %1756 = vst.sshfl [vmem:[#allocation11] sm:$0x1 pattern:$0x73625140] %v1147_v12  ;;  %v1226_v63 = vrot.slane %v1204_v55, %v2418_v43  ;;  %v1233_v0 = vrot.slane %v1205_v56, %v2418_v43  ;;  %v1234_v1 = vcombine.high %v1212_v57, %v1212_v57  ;;  %v1235_v2 = vcombine.high %v1219_v58, %v1219_v58 }
 0x3e6   :  { %1758 = vst.sshfl [vmem:[#allocation11 + $0x4] sm:$0x1 pattern:$0x73625140] %v1154_v54  ;;  %v1177_v3 = vrot.slane %v1155_v59, %v2418_v43  ;;  %v1184_v4 = vrot.slane %v1156_v60, %v2418_v43  ;;  %v1185_v11 = vcombine.high %v1163_v61, %v1163_v61  ;;  %v1186_v14 = vcombine.high %v1170_v62, %v1170_v62 }
 0x3e7   :  { %1761 = vst.sshfl [vmem:[#allocation11 + $0x9] sm:$0x1 pattern:$0x73625140] %v1204_v55  ;;  %v1236_v5 = vcombine.high %v1226_v63, %v1226_v63  ;;  %v1237_v6 = vcombine.high %v1233_v0, %v1233_v0  ;;  %1606 = vst [vmem:[#allocation11 + $0xa] sm:$0x1] %v1234_v1 }
 0x3e8   :  { %1763 = vst.sshfl [vmem:[#allocation11 + $0xd] sm:$0x1 pattern:$0x73625140] %v1205_v56  ;;  %1610 = vst [vmem:[#allocation11 + $0xe] sm:$0x1] %v1235_v2  ;;  %v1187_v8 = vcombine.high %v1177_v3, %v1177_v3  ;;  %v1188_v9 = vcombine.high %v1184_v4, %v1184_v4 }
 0x3e9   :  { %1757 = vst.sshfl [vmem:[#allocation11 + $0x1] sm:$0x1 pattern:$0x73625140] %v1155_v59  ;;  %1598 = vst [vmem:[#allocation11 + $0x2] sm:$0x1] %v1185_v11 }
 0x3ea   :  { %1759 = vst.sshfl [vmem:[#allocation11 + $0x5] sm:$0x1 pattern:$0x73625140] %v1156_v60  ;;  %1602 = vst [vmem:[#allocation11 + $0x6] sm:$0x1] %v1186_v14 }
 0x3eb   :  { %1607 = vst [vmem:[#allocation11 + $0xb] sm:$0x1] %v1236_v5  ;;  %1611 = vst [vmem:[#allocation11 + $0xf] sm:$0x1] %v1237_v6  ;;  %v1890_v16 = vpop.f32.mrb[32].mxu1 }
 0x3ec   :  { %1599 = vst [vmem:[#allocation11 + $0x3] sm:$0x1] %v1187_v8  ;;  %1603 = vst [vmem:[#allocation11 + $0x7] sm:$0x1] %v1188_v9  ;;  %v1077_v10 = vpop.f32.mrb[33].mxu1  ;;  %v1086_v18 = vadd.f32 %v1890_v16, %v2415_v40 }
 0x3ed   :  { %v1891_v17 = vpop.f32.mrb[34].mxu1  ;;  %v1078_v21 = vadd.f32 %v2415_v40, %v1077_v10 }
 0x3ee   :  { %v1089_v19 = vadd.f32 %v1891_v17, %v2415_v40  ;;  %v1080_v20 = vpop.f32.mrb[35].mxu1 }
 0x3ef   :  { %v1081_v22 = vadd.f32 %v2415_v40, %v1080_v20 }
 0x3f0   :  { %v1127_v23 = vpack.c.bf16 %v1089_v19, %v1086_v18  ;;  %v1751_v24 = vpack.c.bf16 %v1089_v19, %v1089_v19 }
 0x3f1   :  { %v1126_v25 = vpack.c.bf16 %v1081_v22, %v1078_v21  ;;  %v1750_v26 = vpack.c.bf16 %v1081_v22, %v1081_v22 }
 0x3f2   :  { %v1294_v27 = vrot.slane %v1127_v23, %v2418_v43  ;;  %v1301_v13 = vrot.slane %v1751_v24, %v2418_v43 }
 0x3f3   :  { %v1245_v28 = vrot.slane %v1126_v25, %v2418_v43  ;;  %v1252_v29 = vrot.slane %v1750_v26, %v2418_v43 }
 0x3f4   :  { %v1302_v30 = vcombine.high %v1294_v27, %v1294_v27  ;;  %v1303_v15 = vcombine.high %v1301_v13, %v1301_v13  ;;  %v1310_v31 = vrot.slane %v1294_v27, %v2418_v43  ;;  %v1317_v32 = vrot.slane %v1301_v13, %v2418_v43  ;;  %1768 = vst.sshfl [vmem:[#allocation11 + $0x18] sm:$0x1 pattern:$0x73625140] %v1294_v27 }
 0x3f5   :  { %1770 = vst.sshfl [vmem:[#allocation11 + $0x1c] sm:$0x1 pattern:$0x73625140] %v1301_v13  ;;  %v1253_v33 = vcombine.high %v1245_v28, %v1245_v28  ;;  %v1254_v34 = vcombine.high %v1252_v29, %v1252_v29  ;;  %v1261_v35 = vrot.slane %v1245_v28, %v2418_v43  ;;  %v1268_v36 = vrot.slane %v1252_v29, %v2418_v43 }
 0x3f6   :  { %1764 = vst.sshfl [vmem:[#allocation11 + $0x10] sm:$0x1 pattern:$0x73625140] %v1245_v28  ;;  %v1324_v37 = vrot.slane %v1302_v30, %v2418_v43  ;;  %v1331_v38 = vrot.slane %v1303_v15, %v2418_v43  ;;  %v1332_v39 = vcombine.high %v1310_v31, %v1310_v31  ;;  %v1333_v41 = vcombine.high %v1317_v32, %v1317_v32 }
 0x3f7   :  { %1766 = vst.sshfl [vmem:[#allocation11 + $0x14] sm:$0x1 pattern:$0x73625140] %v1252_v29  ;;  %v1275_v42 = vrot.slane %v1253_v33, %v2418_v43  ;;  %v1282_v7 = vrot.slane %v1254_v34, %v2418_v43  ;;  %v1283_v44 = vcombine.high %v1261_v35, %v1261_v35  ;;  %v1284_v45 = vcombine.high %v1268_v36, %v1268_v36 }
 0x3f8   :  { %1769 = vst.sshfl [vmem:[#allocation11 + $0x19] sm:$0x1 pattern:$0x73625140] %v1302_v30  ;;  %v1334_v46 = vcombine.high %v1324_v37, %v1324_v37  ;;  %v1335_v47 = vcombine.high %v1331_v38, %v1331_v38  ;;  %1622 = vst [vmem:[#allocation11 + $0x1a] sm:$0x1] %v1332_v39 }
 0x3f9   :  { %1771 = vst.sshfl [vmem:[#allocation11 + $0x1d] sm:$0x1 pattern:$0x73625140] %v1303_v15  ;;  %1626 = vst [vmem:[#allocation11 + $0x1e] sm:$0x1] %v1333_v41  ;;  %v1285_v48 = vcombine.high %v1275_v42, %v1275_v42  ;;  %v1286_v49 = vcombine.high %v1282_v7, %v1282_v7 }
 0x3fa   :  { %1765 = vst.sshfl [vmem:[#allocation11 + $0x11] sm:$0x1 pattern:$0x73625140] %v1253_v33  ;;  %1614 = vst [vmem:[#allocation11 + $0x12] sm:$0x1] %v1283_v44 }
 0x3fb   :  { %1767 = vst.sshfl [vmem:[#allocation11 + $0x15] sm:$0x1 pattern:$0x73625140] %v1254_v34  ;;  %1618 = vst [vmem:[#allocation11 + $0x16] sm:$0x1] %v1284_v45 }
 0x3fc   :  { %1623 = vst [vmem:[#allocation11 + $0x1b] sm:$0x1] %v1334_v46  ;;  %1627 = vst [vmem:[#allocation11 + $0x1f] sm:$0x1] %v1335_v47  ;;  %v1894_v50 = vpop.f32.mrb[36].mxu1 }
 0x3fd   :  { %1615 = vst [vmem:[#allocation11 + $0x13] sm:$0x1] %v1285_v48  ;;  %1619 = vst [vmem:[#allocation11 + $0x17] sm:$0x1] %v1286_v49  ;;  %v1093_v51 = vpop.f32.mrb[37].mxu1  ;;  %v1102_v53 = vadd.f32 %v1894_v50, %v2415_v40 }
 0x3fe   :  { %v1895_v52 = vpop.f32.mrb[38].mxu1  ;;  %v1094_v55 = vadd.f32 %v2415_v40, %v1093_v51 }
 0x3ff   :  { %v1105_v12 = vadd.f32 %v1895_v52, %v2415_v40  ;;  %v1096_v54 = vpop.f32.mrb[39].mxu1 }
 0x400   :  { %v1097_v56 = vadd.f32 %v2415_v40, %v1096_v54 }
 0x401   :  { %v1129_v57 = vpack.c.bf16 %v1105_v12, %v1102_v53  ;;  %v1753_v58 = vpack.c.bf16 %v1105_v12, %v1105_v12 }
 0x402   :  { %v1128_v59 = vpack.c.bf16 %v1097_v56, %v1094_v55  ;;  %v1752_v60 = vpack.c.bf16 %v1097_v56, %v1097_v56 }
 0x403   :  { %v1392_v61 = vrot.slane %v1129_v57, %v2418_v43  ;;  %v1399_v62 = vrot.slane %v1753_v58, %v2418_v43 }
 0x404   :  { %v1343_v63 = vrot.slane %v1128_v59, %v2418_v43  ;;  %v1350_v0 = vrot.slane %v1752_v60, %v2418_v43 }
 0x405   :  { %v1400_v1 = vcombine.high %v1392_v61, %v1392_v61  ;;  %v1401_v2 = vcombine.high %v1399_v62, %v1399_v62  ;;  %v1408_v3 = vrot.slane %v1392_v61, %v2418_v43  ;;  %v1415_v4 = vrot.slane %v1399_v62, %v2418_v43  ;;  %1776 = vst.sshfl [vmem:[#allocation11 + $0x28] sm:$0x1 pattern:$0x73625140] %v1392_v61 }
 0x406   :  { %1778 = vst.sshfl [vmem:[#allocation11 + $0x2c] sm:$0x1 pattern:$0x73625140] %v1399_v62  ;;  %v1351_v11 = vcombine.high %v1343_v63, %v1343_v63  ;;  %v1352_v14 = vcombine.high %v1350_v0, %v1350_v0  ;;  %v1359_v5 = vrot.slane %v1343_v63, %v2418_v43  ;;  %v1366_v6 = vrot.slane %v1350_v0, %v2418_v43 }
 0x407   :  { %1772 = vst.sshfl [vmem:[#allocation11 + $0x20] sm:$0x1 pattern:$0x73625140] %v1343_v63  ;;  %v1422_v8 = vrot.slane %v1400_v1, %v2418_v43  ;;  %v1429_v9 = vrot.slane %v1401_v2, %v2418_v43  ;;  %v1430_v16 = vcombine.high %v1408_v3, %v1408_v3  ;;  %v1431_v10 = vcombine.high %v1415_v4, %v1415_v4 }
 0x408   :  { %1774 = vst.sshfl [vmem:[#allocation11 + $0x24] sm:$0x1 pattern:$0x73625140] %v1350_v0  ;;  %v1373_v17 = vrot.slane %v1351_v11, %v2418_v43  ;;  %v1380_v18 = vrot.slane %v1352_v14, %v2418_v43  ;;  %v1381_v19 = vcombine.high %v1359_v5, %v1359_v5  ;;  %v1382_v20 = vcombine.high %v1366_v6, %v1366_v6 }
 0x409   :  { %1777 = vst.sshfl [vmem:[#allocation11 + $0x29] sm:$0x1 pattern:$0x73625140] %v1400_v1  ;;  %v1432_v21 = vcombine.high %v1422_v8, %v1422_v8  ;;  %v1433_v22 = vcombine.high %v1429_v9, %v1429_v9  ;;  %1638 = vst [vmem:[#allocation11 + $0x2a] sm:$0x1] %v1430_v16 }
 0x40a   :  { %1779 = vst.sshfl [vmem:[#allocation11 + $0x2d] sm:$0x1 pattern:$0x73625140] %v1401_v2  ;;  %1642 = vst [vmem:[#allocation11 + $0x2e] sm:$0x1] %v1431_v10  ;;  %v1383_v23 = vcombine.high %v1373_v17, %v1373_v17  ;;  %v1384_v24 = vcombine.high %v1380_v18, %v1380_v18 }
 0x40b   :  { %1773 = vst.sshfl [vmem:[#allocation11 + $0x21] sm:$0x1 pattern:$0x73625140] %v1351_v11  ;;  %1630 = vst [vmem:[#allocation11 + $0x22] sm:$0x1] %v1381_v19 }
 0x40c   :  { %1775 = vst.sshfl [vmem:[#allocation11 + $0x25] sm:$0x1 pattern:$0x73625140] %v1352_v14  ;;  %1634 = vst [vmem:[#allocation11 + $0x26] sm:$0x1] %v1382_v20 }
 0x40d   :  { %1639 = vst [vmem:[#allocation11 + $0x2b] sm:$0x1] %v1432_v21  ;;  %1643 = vst [vmem:[#allocation11 + $0x2f] sm:$0x1] %v1433_v22  ;;  %v1898_v25 = vpop.f32.mrb[40].mxu1 }
 0x40e   :  { %1631 = vst [vmem:[#allocation11 + $0x23] sm:$0x1] %v1383_v23  ;;  %1635 = vst [vmem:[#allocation11 + $0x27] sm:$0x1] %v1384_v24  ;;  %v1109_v26 = vpop.f32.mrb[41].mxu1  ;;  %v1118_v13 = vadd.f32 %v1898_v25, %v2415_v40 }
 0x40f   :  { %v1899_v27 = vpop.f32.mrb[42].mxu1  ;;  %v1110_v30 = vadd.f32 %v2415_v40, %v1109_v26 }
 0x410   :  { %v1121_v28 = vadd.f32 %v1899_v27, %v2415_v40  ;;  %v1112_v29 = vpop.f32.mrb[43].mxu1 }
 0x411   :  { %v1113_v15 = vadd.f32 %v2415_v40, %v1112_v29 }
 0x412   :  { %v1131_v31 = vpack.c.bf16 %v1121_v28, %v1118_v13  ;;  %v1755_v32 = vpack.c.bf16 %v1121_v28, %v1121_v28 }
 0x413   :  { %v1130_v33 = vpack.c.bf16 %v1113_v15, %v1110_v30  ;;  %v1754_v34 = vpack.c.bf16 %v1113_v15, %v1113_v15 }
 0x414   :  { %v1490_v35 = vrot.slane %v1131_v31, %v2418_v43  ;;  %v1497_v36 = vrot.slane %v1755_v32, %v2418_v43 }
 0x415   :  { %v1441_v37 = vrot.slane %v1130_v33, %v2418_v43  ;;  %v1448_v38 = vrot.slane %v1754_v34, %v2418_v43 }
 0x416   :  { %v1498_v39 = vcombine.high %v1490_v35, %v1490_v35  ;;  %v1499_v41 = vcombine.high %v1497_v36, %v1497_v36  ;;  %v1506_v42 = vrot.slane %v1490_v35, %v2418_v43  ;;  %v1513_v7 = vrot.slane %v1497_v36, %v2418_v43  ;;  %1784 = vst.sshfl [vmem:[#allocation11 + $0x38] sm:$0x1 pattern:$0x73625140] %v1490_v35 }
 0x417   :  { %1786 = vst.sshfl [vmem:[#allocation11 + $0x3c] sm:$0x1 pattern:$0x73625140] %v1497_v36  ;;  %v1449_v40 = vcombine.high %v1441_v37, %v1441_v37  ;;  %v1450_v44 = vcombine.high %v1448_v38, %v1448_v38  ;;  %v1457_v45 = vrot.slane %v1441_v37, %v2418_v43  ;;  %v1464_v46 = vrot.slane %v1448_v38, %v2418_v43 }
 0x418   :  { %1780 = vst.sshfl [vmem:[#allocation11 + $0x30] sm:$0x1 pattern:$0x73625140] %v1441_v37  ;;  %v1520_v47 = vrot.slane %v1498_v39, %v2418_v43  ;;  %v1527_v48 = vrot.slane %v1499_v41, %v2418_v43  ;;  %v1528_v49 = vcombine.high %v1506_v42, %v1506_v42  ;;  %v1529_v50 = vcombine.high %v1513_v7, %v1513_v7 }
 0x419   :  { %1782 = vst.sshfl [vmem:[#allocation11 + $0x34] sm:$0x1 pattern:$0x73625140] %v1448_v38  ;;  %v1471_v51 = vrot.slane %v1449_v40, %v2418_v43  ;;  %v1478_v52 = vrot.slane %v1450_v44, %v2418_v43  ;;  %v1479_v53 = vcombine.high %v1457_v45, %v1457_v45  ;;  %v1480_v12 = vcombine.high %v1464_v46, %v1464_v46 }
 0x41a   :  { %1785 = vst.sshfl [vmem:[#allocation11 + $0x39] sm:$0x1 pattern:$0x73625140] %v1498_v39  ;;  %v1530_v54 = vcombine.high %v1520_v47, %v1520_v47  ;;  %v1531_v55 = vcombine.high %v1527_v48, %v1527_v48  ;;  %1654 = vst [vmem:[#allocation11 + $0x3a] sm:$0x1] %v1528_v49 }
 0x41b   :  { %1787 = vst.sshfl [vmem:[#allocation11 + $0x3d] sm:$0x1 pattern:$0x73625140] %v1499_v41  ;;  %1658 = vst [vmem:[#allocation11 + $0x3e] sm:$0x1] %v1529_v50  ;;  %v1481_v56 = vcombine.high %v1471_v51, %v1471_v51  ;;  %v1482_v57 = vcombine.high %v1478_v52, %v1478_v52 }
 0x41c   :  { %1781 = vst.sshfl [vmem:[#allocation11 + $0x31] sm:$0x1 pattern:$0x73625140] %v1449_v40  ;;  %1646 = vst [vmem:[#allocation11 + $0x32] sm:$0x1] %v1479_v53 }
 0x41d   :  { %1783 = vst.sshfl [vmem:[#allocation11 + $0x35] sm:$0x1 pattern:$0x73625140] %v1450_v44  ;;  %1650 = vst [vmem:[#allocation11 + $0x36] sm:$0x1] %v1480_v12 }
 0x41e   :  { %1655 = vst [vmem:[#allocation11 + $0x3b] sm:$0x1] %v1530_v54  ;;  %1659 = vst [vmem:[#allocation11 + $0x3f] sm:$0x1] %v1531_v55 }
 0x41f   :  { %1647 = vst [vmem:[#allocation11 + $0x33] sm:$0x1] %v1481_v56  ;;  %1651 = vst [vmem:[#allocation11 + $0x37] sm:$0x1] %v1482_v57 }
 0x420   :  { %1664 = vsyncadd [#allocation4], 1008  ;;  %s2159_s8 = smov [#allocation11]  }
 0x421   :  { %s1665_s13 = sshll.u32 %s2159_s8, 4  ;;  %s1666_s13 = int_to_ptr.vmem [resolvable:$true] %s1665_s13 }
 0x422   :  { %s2116_s14 = scalar_lea.vmem %s1666_s13, 16  ;;  %s2120_s16 = scalar_lea.vmem %s1666_s13, 1024 }
 0x423   :  { %p2117_p12 = scmp.ne.s32.totalorder %s1666_s13, %s2116_s14  ;;  %p2121_p13 = scmp.lt.s32.totalorder %s1666_s13, %s1666_s13 }
 0x424   :  { %p2122_p0 = scmp.lt.s32.totalorder %s2120_s16, %s2116_s14 }
 0x426   :  { %p2123_p1 = por %p2122_p0, %p2121_p13 }
 0x428   :  { %p2124_p2 = pnand %p2123_p1, %p2117_p12 }
 0x42a   :  { %2127 = shalt.err (!%p2124_p2)
}
 0x42b   :  { %s2128_s0 = scalar_lea.hbm %s2505_s9, 16 }
 0x42c   :  { %p2129_p3 = scmp.ne.s32.totalorder %s2505_s9, %s2128_s0  ;;  %p2132_p4 = scmp.lt.u32.totalorder %s2128_s0, %s2505_s9 }
 0x42e   :  { %p2134_p5 = pnand %p2132_p4, %p2129_p3 }
 0x430   :  { %2137 = shalt.err (!%p2134_p5)
}
 0x431   :  { %s2160_s22 = smov 16   ;;  %s2161_s23 = smov 1  }
 0x432   :  { %1671 = dma.vmem_to_hbm [thread:$0]  %s1666_s13, 16, %s2505_s9, [#allocation4], %s2160_s22, %s2160_s22, %s2161_s23  }
 0x433   :  { %2144 = dma.done.wait [#allocation4], 1024  }
 0x434   :  { %2145 = vsyncadd [#allocation4], 4294966272 }
 0x435   :  { %1675 = vsyncpa [#allocation3], 1 }
 0x436   :  { %1676 = vsyncpa [#allocation6], 1 }
 0x437   :  { %1677 = vsyncpa [#allocation9], 1 }
 0x438   :  { %1678 = vsyncpa [#allocation4], 1 }

</bundles_post_ra>
